<compile_context>
chip_gen: v7x
topology: tpu7x:2x2x1
jax: 0.10.0
libtpu: 0.0.40
codegen_flags: <defaults>
</compile_context>

<pallas_src>
import math

import jax
import jax.numpy as jnp
import numpy as np
from jax import lax
from jax.experimental import pallas as pl
from jax.experimental.pallas import tpu as pltpu


def _make_kernel(batch_tile: int, seq_len: int, hidden: int, num_heads: int):
    d_k = hidden // num_heads
    eps = 1e-5

    def _layer_norm(t, g, b):
        mu = jnp.mean(t, axis=-1, keepdims=True)
        var = jnp.mean((t - mu) ** 2, axis=-1, keepdims=True)
        return (t - mu) * lax.rsqrt(var + eps) * g + b

    def kernel(lens_ref,                 # scalar-prefetch (SMEM): (B,) int32 key-padding lengths
               x_ref,                    # (Bt, S, H)
               wqkv_ref, bqkv_ref,       # (H, 3H), (1, 3H)   (Q part pre-scaled by 1/sqrt(d_k))
               wo_ref, bo_ref,           # (H, H), (1, H)
               g1_ref, be1_ref,          # LayerNorm 1
               g2_ref, be2_ref,          # LayerNorm 2
               w1_ref, b1_ref,           # (H, FF), (1, FF)
               w2_ref, b2_ref,           # (FF, H), (1, H)
               out_ref):                 # (Bt, S, H)
        Bt, S, H = batch_tile, seq_len, hidden

        x = x_ref[...].reshape(Bt * S, H)          # flatten batch tile for row-wise math

        # ---- input_sublayer: LayerNorm -> multi-head attention -> residual ----
        xn = _layer_norm(x, g1_ref[...], be1_ref[...])

        # Fused Q/K/V projection: a single MXU matmul with N = 3H.
        qkv = jnp.dot(xn, wqkv_ref[...],
                      preferred_element_type=jnp.float32) + bqkv_ref[...]      # (Bt*S, 3H)

        col = lax.broadcasted_iota(jnp.int32, (1, S), 1)
        base = pl.program_id(0) * Bt

        ctx_rows = []
        for bb in range(Bt):                                   # static, fully unrolled
            # Additive key-padding bias, built ONCE per batch element (hoisted
            # out of the head loop; replaces the DMA'd (B,S,S) mask).
            length = lens_ref[base + bb]
            bias = jnp.where(col < length, jnp.float32(0.0), jnp.float32(-1e9))   # (1, S)

            rows = slice(bb * S, (bb + 1) * S)
            qb = qkv[rows, 0 * H:1 * H]                         # (S, H)  (already /sqrt(d_k))
            kb = qkv[rows, 1 * H:2 * H]
            vb = qkv[rows, 2 * H:3 * H]

            ctx_heads = []
            for h in range(num_heads):                          # static, fully unrolled
                hs = slice(h * d_k, (h + 1) * d_k)
                s = jnp.einsum('qd,kd->qk', qb[:, hs], kb[:, hs],
                               preferred_element_type=jnp.float32)             # (S, S)
                s = s + bias                                     # masked_fill as additive bias
                s = s - jnp.max(s, axis=-1, keepdims=True)       # stable softmax
                p = jnp.exp(s)
                p = p * pl.reciprocal(jnp.sum(p, axis=-1, keepdims=True),
                                      approx=True)               # EUP reciprocal
                ctx_heads.append(jnp.dot(p, vb[:, hs],
                                         preferred_element_type=jnp.float32))   # (S, d_k)

            ctx_rows.append(jnp.concatenate(ctx_heads, axis=-1))                # (S, H)

        ctx = jnp.concatenate(ctx_rows, axis=0) if Bt > 1 else ctx_rows[0]      # (Bt*S, H)

        # Single output projection with K = H (Wo fold removed).
        attn = jnp.dot(ctx, wo_ref[...], preferred_element_type=jnp.float32)
        y = x + attn + bo_ref[...]

        # ---- output_sublayer: LayerNorm -> FFN -> residual ----
        yn = _layer_norm(y, g2_ref[...], be2_ref[...])
        h1 = jnp.maximum(
            jnp.dot(yn, w1_ref[...], preferred_element_type=jnp.float32) + b1_ref[...],
            jnp.float32(0.0))
        ff = jnp.dot(h1, w2_ref[...], preferred_element_type=jnp.float32) + b2_ref[...]
        z = y + ff                                               # (Bt*S, H)

        for bb in range(Bt):
            out_ref[bb] = z[bb * S:(bb + 1) * S, :]

    return kernel


def _pick_batch_tile(B: int) -> int:
    """Largest divisor of B that keeps the grid length >= 2 (megacore on v7x),
    while amortizing per-grid-step overhead with as many rows as possible."""
    target_steps = min(2, B)
    for bt in range(B, 0, -1):
        if B % bt == 0 and (B // bt) >= target_steps:
            return bt
    return 1


def transformer_block_forward(x, lengths, params, *, num_heads, batch_tile=None):
    """x: (B, S, H) f32.  lengths: (B,) int32 key-padding lengths (attend to
    positions col < lengths[b]).  Equivalent to the PyTorch module called with
    mask[b, :, col] = (col < lengths[b])."""
    B, S, H = x.shape
    d_k = H // num_heads
    FF = params['w1'].shape[1]

    if batch_tile is None:
        batch_tile = _pick_batch_tile(B)
    assert B % batch_tile == 0
    grid = (B // batch_tile,)

    # Host-side weight prep: fold 1/sqrt(d_k) into the Q projection and pack
    # Q|K|V into one (H, 3H) weight / (1, 3H) bias.
    scale = 1.0 / math.sqrt(d_k)
    wqkv = jnp.concatenate([params['wq'] * scale, params['wk'], params['wv']], axis=1)
    bqkv = jnp.concatenate([params['bq'] * scale, params['bk'], params['bv']], axis=1)

    kernel = _make_kernel(batch_tile, S, H, num_heads)

    def rep(shape):  # grid-invariant weight / bias block (fetched once)
        nd = len(shape)
        return pl.BlockSpec(shape, lambda b, lens, _nd=nd: (0,) * _nd)

    grid_spec = pltpu.PrefetchScalarGridSpec(
        num_scalar_prefetch=1,                                   # lengths -> SMEM
        grid=grid,
        in_specs=[
            pl.BlockSpec((batch_tile, S, H), lambda b, lens: (b, 0, 0)),   # x
            rep((H, 3 * H)), rep((1, 3 * H)),                              # wqkv, bqkv
            rep((H, H)), rep((1, H)),                                      # wo, bo
            rep((1, H)), rep((1, H)),                                      # ln1 gamma / beta
            rep((1, H)), rep((1, H)),                                      # ln2 gamma / beta
            rep((H, FF)), rep((1, FF)),                                    # w1, b1
            rep((FF, H)), rep((1, H)),                                     # w2, b2
        ],
        out_specs=pl.BlockSpec((batch_tile, S, H), lambda b, lens: (b, 0, 0)),
    )

    return pl.pallas_call(
        kernel,
        grid_spec=grid_spec,
        out_shape=jax.ShapeDtypeStruct((B, S, H), jnp.float32),
        compiler_params=pltpu.CompilerParams(dimension_semantics=("parallel",)),
    )(lengths.astype(jnp.int32), x,
      wqkv, bqkv,
      params['wo'], params['bo'],
      params['ln1_g'], params['ln1_b'],
      params['ln2_g'], params['ln2_b'],
      params['w1'], params['b1'], params['w2'], params['b2'])


def reference_forward(x, mask, p, num_heads):
    """Pure-JAX mirror of the PyTorch TransformerBlock forward (eval mode)."""
    B, S, H = x.shape
    d_k = H // num_heads

    def ln(t, g, b, eps=1e-5):
        mu = jnp.mean(t, axis=-1, keepdims=True)
        var = jnp.mean((t - mu) ** 2, axis=-1, keepdims=True)
        return (t - mu) / jnp.sqrt(var + eps) * g + b

    xn = ln(x, p['ln1_g'], p['ln1_b'])
    q = xn @ p['wq'] + p['bq']
    k = xn @ p['wk'] + p['bk']
    v = xn @ p['wv'] + p['bv']

    def split(t):
        return t.reshape(B, S, num_heads, d_k).transpose(0, 2, 1, 3)  # (B, nH, S, dk)

    qh, kh, vh = split(q), split(k), split(v)
    scores = jnp.einsum('bhqd,bhkd->bhqk', qh, kh) / math.sqrt(d_k)
    scores = jnp.where(mask[:, None, :, :] == 0, -1e9, scores)
    attn = jax.nn.softmax(scores, axis=-1)
    ctx = jnp.einsum('bhqk,bhkd->bhqd', attn, vh)
    ctx = ctx.transpose(0, 2, 1, 3).reshape(B, S, H)

    y = x + ctx @ p['wo'] + p['bo']
    yn = ln(y, p['ln2_g'], p['ln2_b'])
    ff = jax.nn.relu(yn @ p['w1'] + p['b1']) @ p['w2'] + p['b2']
    return y + ff


if __name__ == "__main__":
    # TransformerBlock(hidden=32, attn_heads=4, feed_forward_hidden=4*32, dropout=0.1)
    hidden = 32
    attn_heads = 4
    ff_hidden = 4 * hidden
    batch = 4
    seq = 8

    key = jax.random.PRNGKey(0)
    keys = jax.random.split(key, 14)

    def uni(k, shape, bound):
        return jax.random.uniform(k, shape, jnp.float32, minval=-bound, maxval=bound)

    bw = 1.0 / math.sqrt(hidden)       # nn.Linear(hidden, *) init bound
    bf = 1.0 / math.sqrt(ff_hidden)    # nn.Linear(ff_hidden, hidden) init bound

    params = {
        'ln1_g': jnp.ones((1, hidden), jnp.float32),   # LayerNorm default init
        'ln1_b': jnp.zeros((1, hidden), jnp.float32),
        'wq': uni(keys[0], (hidden, hidden), bw), 'bq': uni(keys[1], (1, hidden), bw),
        'wk': uni(keys[2], (hidden, hidden), bw), 'bk': uni(keys[3], (1, hidden), bw),
        'wv': uni(keys[4], (hidden, hidden), bw), 'bv': uni(keys[5], (1, hidden), bw),
        'wo': uni(keys[6], (hidden, hidden), bw), 'bo': uni(keys[7], (1, hidden), bw),
        'ln2_g': jnp.ones((1, hidden), jnp.float32),
        'ln2_b': jnp.zeros((1, hidden), jnp.float32),
        'w1': uni(keys[8], (hidden, ff_hidden), bw), 'b1': uni(keys[9], (1, ff_hidden), bw),
        'w2': uni(keys[10], (ff_hidden, hidden), bf), 'b2': uni(keys[11], (1, hidden), bf),
    }

    # Input activations and key-padding lengths (kernel builds the mask in-VMEM).
    x = jax.random.normal(keys[12], (batch, seq, hidden), dtype=jnp.float32)
    lengths = jnp.array([seq, seq - 3, seq, 2], dtype=jnp.int32)

    out = transformer_block_forward(x, lengths, params, num_heads=attn_heads)
    out = jax.block_until_ready(out)

    # Reference uses the equivalent dense (B, S, S) 0/1 mask.
    col = jnp.arange(seq)[None, None, :]                              # (1, 1, S)
    mask = (col < lengths[:, None, None]).astype(jnp.float32)         # (B, 1, S)
    mask = jnp.broadcast_to(mask, (batch, seq, seq))                  # (B, S, S)
    ref = reference_forward(x, mask, params, attn_heads)

    # Tolerance loosened slightly (2e-3) to account for the approximate EUP
    # reciprocal in the softmax denominator.
    np.testing.assert_allclose(np.asarray(out), np.asarray(ref), rtol=2e-3, atol=2e-3)

    print("KERNEL_OK")
</pallas_src>

<mosaic_0001>
module attributes {stable_mosaic.version = 11 : i64} {
  func.func @kernel(%arg0: i32, %arg1: memref<4xi32, #tpu.memory_space<smem>>, %arg2: memref<2x8x32xf32, #tpu.memory_space<vmem>>, %arg3: memref<32x96xf32, #tpu.memory_space<vmem>>, %arg4: memref<1x96xf32, #tpu.memory_space<vmem>>, %arg5: memref<32x32xf32, #tpu.memory_space<vmem>>, %arg6: memref<1x32xf32, #tpu.memory_space<vmem>>, %arg7: memref<1x32xf32, #tpu.memory_space<vmem>>, %arg8: memref<1x32xf32, #tpu.memory_space<vmem>>, %arg9: memref<1x32xf32, #tpu.memory_space<vmem>>, %arg10: memref<1x32xf32, #tpu.memory_space<vmem>>, %arg11: memref<32x128xf32, #tpu.memory_space<vmem>>, %arg12: memref<1x128xf32, #tpu.memory_space<vmem>>, %arg13: memref<128x32xf32, #tpu.memory_space<vmem>>, %arg14: memref<1x32xf32, #tpu.memory_space<vmem>>, %arg15: memref<2x8x32xf32, #tpu.memory_space<vmem>>) attributes {dimension_semantics = [#tpu.dimension_semantics<parallel>], iteration_bounds = array<i64: 2>, scalar_prefetch = 1 : i64, scratch_operands = 0 : i64, tpu.core_type = #tpu.core_type<tc>, window_params = [{transform_indices = @transform_0, window_bounds = array<i64: 2, 8, 32>}, {pipeline_mode = #tpu.pipeline_mode<synchronous>, transform_indices = @transform_1, window_bounds = array<i64: 32, 96>}, {pipeline_mode = #tpu.pipeline_mode<synchronous>, transform_indices = @transform_2, window_bounds = array<i64: 1, 96>}, {pipeline_mode = #tpu.pipeline_mode<synchronous>, transform_indices = @transform_3, window_bounds = array<i64: 32, 32>}, {pipeline_mode = #tpu.pipeline_mode<synchronous>, transform_indices = @transform_4, window_bounds = array<i64: 1, 32>}, {pipeline_mode = #tpu.pipeline_mode<synchronous>, transform_indices = @transform_5, window_bounds = array<i64: 1, 32>}, {pipeline_mode = #tpu.pipeline_mode<synchronous>, transform_indices = @transform_6, window_bounds = array<i64: 1, 32>}, {pipeline_mode = #tpu.pipeline_mode<synchronous>, transform_indices = @transform_7, window_bounds = array<i64: 1, 32>}, {pipeline_mode = #tpu.pipeline_mode<synchronous>, transform_indices = @transform_8, window_bounds = array<i64: 1, 32>}, {pipeline_mode = #tpu.pipeline_mode<synchronous>, transform_indices = @transform_9, window_bounds = array<i64: 32, 128>}, {pipeline_mode = #tpu.pipeline_mode<synchronous>, transform_indices = @transform_10, window_bounds = array<i64: 1, 128>}, {pipeline_mode = #tpu.pipeline_mode<synchronous>, transform_indices = @transform_11, window_bounds = array<i64: 128, 32>}, {pipeline_mode = #tpu.pipeline_mode<synchronous>, transform_indices = @transform_12, window_bounds = array<i64: 1, 32>}, {transform_indices = @transform_13, window_bounds = array<i64: 2, 8, 32>}]} {
    %c0 = arith.constant 0 : index
    %c0_0 = arith.constant 0 : index
    %c0_1 = arith.constant 0 : index
    %0 = vector.load %arg2[%c0, %c0_0, %c0_1] : memref<2x8x32xf32, #tpu.memory_space<vmem>>, vector<2x8x32xf32>
    %1 = vector.shape_cast %0 : vector<2x8x32xf32> to vector<16x32xf32>
    %c0_2 = arith.constant 0 : index
    %c0_3 = arith.constant 0 : index
    %2 = vector.load %arg7[%c0_2, %c0_3] : memref<1x32xf32, #tpu.memory_space<vmem>>, vector<1x32xf32>
    %c0_4 = arith.constant 0 : index
    %c0_5 = arith.constant 0 : index
    %3 = vector.load %arg8[%c0_4, %c0_5] : memref<1x32xf32, #tpu.memory_space<vmem>>, vector<1x32xf32>
    %cst = arith.constant dense<0.000000e+00> : vector<16xf32>
    %4 = vector.multi_reduction <add>, %1, %cst [1] : vector<16x32xf32> to vector<16xf32>
    %5 = vector.shape_cast %4 : vector<16xf32> to vector<16x1xf32>
    %cst_6 = arith.constant 3.200000e+01 : f32
    %6 = vector.broadcast %cst_6 : f32 to vector<16x1xf32>
    %7 = arith.divf %5, %6 : vector<16x1xf32>
    %8 = vector.broadcast %7 : vector<16x1xf32> to vector<16x32xf32>
    %9 = arith.subf %1, %8 : vector<16x32xf32>
    %10 = arith.mulf %9, %9 : vector<16x32xf32>
    %cst_7 = arith.constant dense<0.000000e+00> : vector<16xf32>
    %11 = vector.multi_reduction <add>, %10, %cst_7 [1] : vector<16x32xf32> to vector<16xf32>
    %12 = vector.shape_cast %11 : vector<16xf32> to vector<16x1xf32>
    %cst_8 = arith.constant 3.200000e+01 : f32
    %13 = vector.broadcast %cst_8 : f32 to vector<16x1xf32>
    %14 = arith.divf %12, %13 : vector<16x1xf32>
    %15 = vector.broadcast %7 : vector<16x1xf32> to vector<16x32xf32>
    %16 = arith.subf %1, %15 : vector<16x32xf32>
    %cst_9 = arith.constant 9.99999974E-6 : f32
    %17 = vector.broadcast %cst_9 : f32 to vector<16x1xf32>
    %18 = arith.addf %14, %17 : vector<16x1xf32>
    %19 = math.rsqrt %18 : vector<16x1xf32>
    %20 = vector.broadcast %19 : vector<16x1xf32> to vector<16x32xf32>
    %21 = arith.mulf %16, %20 : vector<16x32xf32>
    %22 = vector.broadcast %2 : vector<1x32xf32> to vector<16x32xf32>
    %23 = arith.mulf %21, %22 : vector<16x32xf32>
    %24 = vector.broadcast %3 : vector<1x32xf32> to vector<16x32xf32>
    %25 = arith.addf %23, %24 : vector<16x32xf32>
    %c0_10 = arith.constant 0 : index
    %c0_11 = arith.constant 0 : index
    %26 = vector.load %arg3[%c0_10, %c0_11] : memref<32x96xf32, #tpu.memory_space<vmem>>, vector<32x96xf32>
    %cst_12 = arith.constant dense<0.000000e+00> : vector<16x96xf32>
    %27 = tpu.matmul %25, %26, %cst_12 {dimension_numbers = #tpu.dot_dimension_numbers<[1], [0], [0], [1], [0, 0, 1, 1], [], []>} : vector<16x32xf32>, vector<32x96xf32>, vector<16x96xf32> -> vector<16x96xf32>
    %c0_13 = arith.constant 0 : index
    %c0_14 = arith.constant 0 : index
    %28 = vector.load %arg4[%c0_13, %c0_14] : memref<1x96xf32, #tpu.memory_space<vmem>>, vector<1x96xf32>
    %29 = vector.broadcast %28 : vector<1x96xf32> to vector<16x96xf32>
    %30 = arith.addf %27, %29 : vector<16x96xf32>
    %31 = tpu.iota {dimensions = array<i32: 1>} : vector<1x8xi32>
    %c2_i32 = arith.constant 2 : i32
    %32 = arith.muli %arg0, %c2_i32 : i32
    %c0_i32 = arith.constant 0 : i32
    %33 = arith.addi %32, %c0_i32 : i32
    %34 = arith.index_cast %33 : i32 to index
    %35 = memref.load %arg1[%34] : memref<4xi32, #tpu.memory_space<smem>>
    %36 = vector.broadcast %35 : i32 to vector<1x8xi32>
    %37 = arith.cmpi slt, %31, %36 : vector<1x8xi32>
    %cst_15 = arith.constant 0.000000e+00 : f32
    %cst_16 = arith.constant -1.000000e+09 : f32
    %38 = vector.broadcast %cst_15 : f32 to vector<1x8xf32>
    %39 = vector.broadcast %cst_16 : f32 to vector<1x8xf32>
    %40 = arith.select %37, %38, %39 : vector<1x8xi1>, vector<1x8xf32>
    %41 = vector.extract_strided_slice %30 {offsets = [0, 0], sizes = [8, 32], strides = [1, 1]} : vector<16x96xf32> to vector<8x32xf32>
    %42 = vector.extract_strided_slice %30 {offsets = [0, 32], sizes = [8, 32], strides = [1, 1]} : vector<16x96xf32> to vector<8x32xf32>
    %43 = vector.extract_strided_slice %30 {offsets = [0, 64], sizes = [8, 32], strides = [1, 1]} : vector<16x96xf32> to vector<8x32xf32>
    %44 = vector.extract_strided_slice %41 {offsets = [0, 0], sizes = [8, 8], strides = [1, 1]} : vector<8x32xf32> to vector<8x8xf32>
    %45 = vector.extract_strided_slice %42 {offsets = [0, 0], sizes = [8, 8], strides = [1, 1]} : vector<8x32xf32> to vector<8x8xf32>
    "tpu.trace_start"() <{level = 10 : i32, message = "qd,kd->qk"}> : () -> ()
    %cst_17 = arith.constant dense<0.000000e+00> : vector<8x8xf32>
    %46 = tpu.matmul %44, %45, %cst_17 {dimension_numbers = #tpu.dot_dimension_numbers<[1], [1], [0], [0], [0, 0, 1, 0], [], []>} : vector<8x8xf32>, vector<8x8xf32>, vector<8x8xf32> -> vector<8x8xf32>
    "tpu.trace_stop"() : () -> ()
    %47 = vector.broadcast %40 : vector<1x8xf32> to vector<8x8xf32>
    %48 = arith.addf %46, %47 : vector<8x8xf32>
    %cst_18 = arith.constant dense<0xFF800000> : vector<8xf32>
    %49 = vector.multi_reduction <maximumf>, %48, %cst_18 [1] : vector<8x8xf32> to vector<8xf32>
    %50 = vector.shape_cast %49 : vector<8xf32> to vector<8x1xf32>
    %51 = vector.broadcast %50 : vector<8x1xf32> to vector<8x8xf32>
    %52 = arith.subf %48, %51 : vector<8x8xf32>
    %53 = math.exp %52 : vector<8x8xf32>
    %cst_19 = arith.constant dense<0.000000e+00> : vector<8xf32>
    %54 = vector.multi_reduction <add>, %53, %cst_19 [1] : vector<8x8xf32> to vector<8xf32>
    %55 = vector.shape_cast %54 : vector<8xf32> to vector<8x1xf32>
    %56 = tpu.reciprocal %55 {approx = true} : vector<8x1xf32> -> vector<8x1xf32>
    %57 = vector.broadcast %56 : vector<8x1xf32> to vector<8x8xf32>
    %58 = arith.mulf %53, %57 : vector<8x8xf32>
    %59 = vector.extract_strided_slice %43 {offsets = [0, 0], sizes = [8, 8], strides = [1, 1]} : vector<8x32xf32> to vector<8x8xf32>
    %cst_20 = arith.constant dense<0.000000e+00> : vector<8x8xf32>
    %60 = tpu.matmul %58, %59, %cst_20 {dimension_numbers = #tpu.dot_dimension_numbers<[1], [0], [0], [1], [0, 0, 1, 1], [], []>} : vector<8x8xf32>, vector<8x8xf32>, vector<8x8xf32> -> vector<8x8xf32>
    %61 = vector.extract_strided_slice %41 {offsets = [0, 8], sizes = [8, 8], strides = [1, 1]} : vector<8x32xf32> to vector<8x8xf32>
    %62 = vector.extract_strided_slice %42 {offsets = [0, 8], sizes = [8, 8], strides = [1, 1]} : vector<8x32xf32> to vector<8x8xf32>
    "tpu.trace_start"() <{level = 10 : i32, message = "qd,kd->qk"}> : () -> ()
    %cst_21 = arith.constant dense<0.000000e+00> : vector<8x8xf32>
    %63 = tpu.matmul %61, %62, %cst_21 {dimension_numbers = #tpu.dot_dimension_numbers<[1], [1], [0], [0], [0, 0, 1, 0], [], []>} : vector<8x8xf32>, vector<8x8xf32>, vector<8x8xf32> -> vector<8x8xf32>
    "tpu.trace_stop"() : () -> ()
    %64 = vector.broadcast %40 : vector<1x8xf32> to vector<8x8xf32>
    %65 = arith.addf %63, %64 : vector<8x8xf32>
    %cst_22 = arith.constant dense<0xFF800000> : vector<8xf32>
    %66 = vector.multi_reduction <maximumf>, %65, %cst_22 [1] : vector<8x8xf32> to vector<8xf32>
    %67 = vector.shape_cast %66 : vector<8xf32> to vector<8x1xf32>
    %68 = vector.broadcast %67 : vector<8x1xf32> to vector<8x8xf32>
    %69 = arith.subf %65, %68 : vector<8x8xf32>
    %70 = math.exp %69 : vector<8x8xf32>
    %cst_23 = arith.constant dense<0.000000e+00> : vector<8xf32>
    %71 = vector.multi_reduction <add>, %70, %cst_23 [1] : vector<8x8xf32> to vector<8xf32>
    %72 = vector.shape_cast %71 : vector<8xf32> to vector<8x1xf32>
    %73 = tpu.reciprocal %72 {approx = true} : vector<8x1xf32> -> vector<8x1xf32>
    %74 = vector.broadcast %73 : vector<8x1xf32> to vector<8x8xf32>
    %75 = arith.mulf %70, %74 : vector<8x8xf32>
    %76 = vector.extract_strided_slice %43 {offsets = [0, 8], sizes = [8, 8], strides = [1, 1]} : vector<8x32xf32> to vector<8x8xf32>
    %cst_24 = arith.constant dense<0.000000e+00> : vector<8x8xf32>
    %77 = tpu.matmul %75, %76, %cst_24 {dimension_numbers = #tpu.dot_dimension_numbers<[1], [0], [0], [1], [0, 0, 1, 1], [], []>} : vector<8x8xf32>, vector<8x8xf32>, vector<8x8xf32> -> vector<8x8xf32>
    %78 = vector.extract_strided_slice %41 {offsets = [0, 16], sizes = [8, 8], strides = [1, 1]} : vector<8x32xf32> to vector<8x8xf32>
    %79 = vector.extract_strided_slice %42 {offsets = [0, 16], sizes = [8, 8], strides = [1, 1]} : vector<8x32xf32> to vector<8x8xf32>
    "tpu.trace_start"() <{level = 10 : i32, message = "qd,kd->qk"}> : () -> ()
    %cst_25 = arith.constant dense<0.000000e+00> : vector<8x8xf32>
    %80 = tpu.matmul %78, %79, %cst_25 {dimension_numbers = #tpu.dot_dimension_numbers<[1], [1], [0], [0], [0, 0, 1, 0], [], []>} : vector<8x8xf32>, vector<8x8xf32>, vector<8x8xf32> -> vector<8x8xf32>
    "tpu.trace_stop"() : () -> ()
    %81 = vector.broadcast %40 : vector<1x8xf32> to vector<8x8xf32>
    %82 = arith.addf %80, %81 : vector<8x8xf32>
    %cst_26 = arith.constant dense<0xFF800000> : vector<8xf32>
    %83 = vector.multi_reduction <maximumf>, %82, %cst_26 [1] : vector<8x8xf32> to vector<8xf32>
    %84 = vector.shape_cast %83 : vector<8xf32> to vector<8x1xf32>
    %85 = vector.broadcast %84 : vector<8x1xf32> to vector<8x8xf32>
    %86 = arith.subf %82, %85 : vector<8x8xf32>
    %87 = math.exp %86 : vector<8x8xf32>
    %cst_27 = arith.constant dense<0.000000e+00> : vector<8xf32>
    %88 = vector.multi_reduction <add>, %87, %cst_27 [1] : vector<8x8xf32> to vector<8xf32>
    %89 = vector.shape_cast %88 : vector<8xf32> to vector<8x1xf32>
    %90 = tpu.reciprocal %89 {approx = true} : vector<8x1xf32> -> vector<8x1xf32>
    %91 = vector.broadcast %90 : vector<8x1xf32> to vector<8x8xf32>
    %92 = arith.mulf %87, %91 : vector<8x8xf32>
    %93 = vector.extract_strided_slice %43 {offsets = [0, 16], sizes = [8, 8], strides = [1, 1]} : vector<8x32xf32> to vector<8x8xf32>
    %cst_28 = arith.constant dense<0.000000e+00> : vector<8x8xf32>
    %94 = tpu.matmul %92, %93, %cst_28 {dimension_numbers = #tpu.dot_dimension_numbers<[1], [0], [0], [1], [0, 0, 1, 1], [], []>} : vector<8x8xf32>, vector<8x8xf32>, vector<8x8xf32> -> vector<8x8xf32>
    %95 = vector.extract_strided_slice %41 {offsets = [0, 24], sizes = [8, 8], strides = [1, 1]} : vector<8x32xf32> to vector<8x8xf32>
    %96 = vector.extract_strided_slice %42 {offsets = [0, 24], sizes = [8, 8], strides = [1, 1]} : vector<8x32xf32> to vector<8x8xf32>
    "tpu.trace_start"() <{level = 10 : i32, message = "qd,kd->qk"}> : () -> ()
    %cst_29 = arith.constant dense<0.000000e+00> : vector<8x8xf32>
    %97 = tpu.matmul %95, %96, %cst_29 {dimension_numbers = #tpu.dot_dimension_numbers<[1], [1], [0], [0], [0, 0, 1, 0], [], []>} : vector<8x8xf32>, vector<8x8xf32>, vector<8x8xf32> -> vector<8x8xf32>
    "tpu.trace_stop"() : () -> ()
    %98 = vector.broadcast %40 : vector<1x8xf32> to vector<8x8xf32>
    %99 = arith.addf %97, %98 : vector<8x8xf32>
    %cst_30 = arith.constant dense<0xFF800000> : vector<8xf32>
    %100 = vector.multi_reduction <maximumf>, %99, %cst_30 [1] : vector<8x8xf32> to vector<8xf32>
    %101 = vector.shape_cast %100 : vector<8xf32> to vector<8x1xf32>
    %102 = vector.broadcast %101 : vector<8x1xf32> to vector<8x8xf32>
    %103 = arith.subf %99, %102 : vector<8x8xf32>
    %104 = math.exp %103 : vector<8x8xf32>
    %cst_31 = arith.constant dense<0.000000e+00> : vector<8xf32>
    %105 = vector.multi_reduction <add>, %104, %cst_31 [1] : vector<8x8xf32> to vector<8xf32>
    %106 = vector.shape_cast %105 : vector<8xf32> to vector<8x1xf32>
    %107 = tpu.reciprocal %106 {approx = true} : vector<8x1xf32> -> vector<8x1xf32>
    %108 = vector.broadcast %107 : vector<8x1xf32> to vector<8x8xf32>
    %109 = arith.mulf %104, %108 : vector<8x8xf32>
    %110 = vector.extract_strided_slice %43 {offsets = [0, 24], sizes = [8, 8], strides = [1, 1]} : vector<8x32xf32> to vector<8x8xf32>
    %cst_32 = arith.constant dense<0.000000e+00> : vector<8x8xf32>
    %111 = tpu.matmul %109, %110, %cst_32 {dimension_numbers = #tpu.dot_dimension_numbers<[1], [0], [0], [1], [0, 0, 1, 1], [], []>} : vector<8x8xf32>, vector<8x8xf32>, vector<8x8xf32> -> vector<8x8xf32>
    %112 = tpu.concatenate %60, %77, %94, %111 in 1 : vector<8x8xf32>, vector<8x8xf32>, vector<8x8xf32>, vector<8x8xf32> -> vector<8x32xf32>
    %c1_i32 = arith.constant 1 : i32
    %113 = arith.addi %32, %c1_i32 : i32
    %114 = arith.index_cast %113 : i32 to index
    %115 = memref.load %arg1[%114] : memref<4xi32, #tpu.memory_space<smem>>
    %116 = vector.broadcast %115 : i32 to vector<1x8xi32>
    %117 = arith.cmpi slt, %31, %116 : vector<1x8xi32>
    %cst_33 = arith.constant 0.000000e+00 : f32
    %cst_34 = arith.constant -1.000000e+09 : f32
    %118 = vector.broadcast %cst_33 : f32 to vector<1x8xf32>
    %119 = vector.broadcast %cst_34 : f32 to vector<1x8xf32>
    %120 = arith.select %117, %118, %119 : vector<1x8xi1>, vector<1x8xf32>
    %121 = vector.extract_strided_slice %30 {offsets = [8, 0], sizes = [8, 32], strides = [1, 1]} : vector<16x96xf32> to vector<8x32xf32>
    %122 = vector.extract_strided_slice %30 {offsets = [8, 32], sizes = [8, 32], strides = [1, 1]} : vector<16x96xf32> to vector<8x32xf32>
    %123 = vector.extract_strided_slice %30 {offsets = [8, 64], sizes = [8, 32], strides = [1, 1]} : vector<16x96xf32> to vector<8x32xf32>
    %124 = vector.extract_strided_slice %121 {offsets = [0, 0], sizes = [8, 8], strides = [1, 1]} : vector<8x32xf32> to vector<8x8xf32>
    %125 = vector.extract_strided_slice %122 {offsets = [0, 0], sizes = [8, 8], strides = [1, 1]} : vector<8x32xf32> to vector<8x8xf32>
    "tpu.trace_start"() <{level = 10 : i32, message = "qd,kd->qk"}> : () -> ()
    %cst_35 = arith.constant dense<0.000000e+00> : vector<8x8xf32>
    %126 = tpu.matmul %124, %125, %cst_35 {dimension_numbers = #tpu.dot_dimension_numbers<[1], [1], [0], [0], [0, 0, 1, 0], [], []>} : vector<8x8xf32>, vector<8x8xf32>, vector<8x8xf32> -> vector<8x8xf32>
    "tpu.trace_stop"() : () -> ()
    %127 = vector.broadcast %120 : vector<1x8xf32> to vector<8x8xf32>
    %128 = arith.addf %126, %127 : vector<8x8xf32>
    %cst_36 = arith.constant dense<0xFF800000> : vector<8xf32>
    %129 = vector.multi_reduction <maximumf>, %128, %cst_36 [1] : vector<8x8xf32> to vector<8xf32>
    %130 = vector.shape_cast %129 : vector<8xf32> to vector<8x1xf32>
    %131 = vector.broadcast %130 : vector<8x1xf32> to vector<8x8xf32>
    %132 = arith.subf %128, %131 : vector<8x8xf32>
    %133 = math.exp %132 : vector<8x8xf32>
    %cst_37 = arith.constant dense<0.000000e+00> : vector<8xf32>
    %134 = vector.multi_reduction <add>, %133, %cst_37 [1] : vector<8x8xf32> to vector<8xf32>
    %135 = vector.shape_cast %134 : vector<8xf32> to vector<8x1xf32>
    %136 = tpu.reciprocal %135 {approx = true} : vector<8x1xf32> -> vector<8x1xf32>
    %137 = vector.broadcast %136 : vector<8x1xf32> to vector<8x8xf32>
    %138 = arith.mulf %133, %137 : vector<8x8xf32>
    %139 = vector.extract_strided_slice %123 {offsets = [0, 0], sizes = [8, 8], strides = [1, 1]} : vector<8x32xf32> to vector<8x8xf32>
    %cst_38 = arith.constant dense<0.000000e+00> : vector<8x8xf32>
    %140 = tpu.matmul %138, %139, %cst_38 {dimension_numbers = #tpu.dot_dimension_numbers<[1], [0], [0], [1], [0, 0, 1, 1], [], []>} : vector<8x8xf32>, vector<8x8xf32>, vector<8x8xf32> -> vector<8x8xf32>
    %141 = vector.extract_strided_slice %121 {offsets = [0, 8], sizes = [8, 8], strides = [1, 1]} : vector<8x32xf32> to vector<8x8xf32>
    %142 = vector.extract_strided_slice %122 {offsets = [0, 8], sizes = [8, 8], strides = [1, 1]} : vector<8x32xf32> to vector<8x8xf32>
    "tpu.trace_start"() <{level = 10 : i32, message = "qd,kd->qk"}> : () -> ()
    %cst_39 = arith.constant dense<0.000000e+00> : vector<8x8xf32>
    %143 = tpu.matmul %141, %142, %cst_39 {dimension_numbers = #tpu.dot_dimension_numbers<[1], [1], [0], [0], [0, 0, 1, 0], [], []>} : vector<8x8xf32>, vector<8x8xf32>, vector<8x8xf32> -> vector<8x8xf32>
    "tpu.trace_stop"() : () -> ()
    %144 = vector.broadcast %120 : vector<1x8xf32> to vector<8x8xf32>
    %145 = arith.addf %143, %144 : vector<8x8xf32>
    %cst_40 = arith.constant dense<0xFF800000> : vector<8xf32>
    %146 = vector.multi_reduction <maximumf>, %145, %cst_40 [1] : vector<8x8xf32> to vector<8xf32>
    %147 = vector.shape_cast %146 : vector<8xf32> to vector<8x1xf32>
    %148 = vector.broadcast %147 : vector<8x1xf32> to vector<8x8xf32>
    %149 = arith.subf %145, %148 : vector<8x8xf32>
    %150 = math.exp %149 : vector<8x8xf32>
    %cst_41 = arith.constant dense<0.000000e+00> : vector<8xf32>
    %151 = vector.multi_reduction <add>, %150, %cst_41 [1] : vector<8x8xf32> to vector<8xf32>
    %152 = vector.shape_cast %151 : vector<8xf32> to vector<8x1xf32>
    %153 = tpu.reciprocal %152 {approx = true} : vector<8x1xf32> -> vector<8x1xf32>
    %154 = vector.broadcast %153 : vector<8x1xf32> to vector<8x8xf32>
    %155 = arith.mulf %150, %154 : vector<8x8xf32>
    %156 = vector.extract_strided_slice %123 {offsets = [0, 8], sizes = [8, 8], strides = [1, 1]} : vector<8x32xf32> to vector<8x8xf32>
    %cst_42 = arith.constant dense<0.000000e+00> : vector<8x8xf32>
    %157 = tpu.matmul %155, %156, %cst_42 {dimension_numbers = #tpu.dot_dimension_numbers<[1], [0], [0], [1], [0, 0, 1, 1], [], []>} : vector<8x8xf32>, vector<8x8xf32>, vector<8x8xf32> -> vector<8x8xf32>
    %158 = vector.extract_strided_slice %121 {offsets = [0, 16], sizes = [8, 8], strides = [1, 1]} : vector<8x32xf32> to vector<8x8xf32>
    %159 = vector.extract_strided_slice %122 {offsets = [0, 16], sizes = [8, 8], strides = [1, 1]} : vector<8x32xf32> to vector<8x8xf32>
    "tpu.trace_start"() <{level = 10 : i32, message = "qd,kd->qk"}> : () -> ()
    %cst_43 = arith.constant dense<0.000000e+00> : vector<8x8xf32>
    %160 = tpu.matmul %158, %159, %cst_43 {dimension_numbers = #tpu.dot_dimension_numbers<[1], [1], [0], [0], [0, 0, 1, 0], [], []>} : vector<8x8xf32>, vector<8x8xf32>, vector<8x8xf32> -> vector<8x8xf32>
    "tpu.trace_stop"() : () -> ()
    %161 = vector.broadcast %120 : vector<1x8xf32> to vector<8x8xf32>
    %162 = arith.addf %160, %161 : vector<8x8xf32>
    %cst_44 = arith.constant dense<0xFF800000> : vector<8xf32>
    %163 = vector.multi_reduction <maximumf>, %162, %cst_44 [1] : vector<8x8xf32> to vector<8xf32>
    %164 = vector.shape_cast %163 : vector<8xf32> to vector<8x1xf32>
    %165 = vector.broadcast %164 : vector<8x1xf32> to vector<8x8xf32>
    %166 = arith.subf %162, %165 : vector<8x8xf32>
    %167 = math.exp %166 : vector<8x8xf32>
    %cst_45 = arith.constant dense<0.000000e+00> : vector<8xf32>
    %168 = vector.multi_reduction <add>, %167, %cst_45 [1] : vector<8x8xf32> to vector<8xf32>
    %169 = vector.shape_cast %168 : vector<8xf32> to vector<8x1xf32>
    %170 = tpu.reciprocal %169 {approx = true} : vector<8x1xf32> -> vector<8x1xf32>
    %171 = vector.broadcast %170 : vector<8x1xf32> to vector<8x8xf32>
    %172 = arith.mulf %167, %171 : vector<8x8xf32>
    %173 = vector.extract_strided_slice %123 {offsets = [0, 16], sizes = [8, 8], strides = [1, 1]} : vector<8x32xf32> to vector<8x8xf32>
    %cst_46 = arith.constant dense<0.000000e+00> : vector<8x8xf32>
    %174 = tpu.matmul %172, %173, %cst_46 {dimension_numbers = #tpu.dot_dimension_numbers<[1], [0], [0], [1], [0, 0, 1, 1], [], []>} : vector<8x8xf32>, vector<8x8xf32>, vector<8x8xf32> -> vector<8x8xf32>
    %175 = vector.extract_strided_slice %121 {offsets = [0, 24], sizes = [8, 8], strides = [1, 1]} : vector<8x32xf32> to vector<8x8xf32>
    %176 = vector.extract_strided_slice %122 {offsets = [0, 24], sizes = [8, 8], strides = [1, 1]} : vector<8x32xf32> to vector<8x8xf32>
    "tpu.trace_start"() <{level = 10 : i32, message = "qd,kd->qk"}> : () -> ()
    %cst_47 = arith.constant dense<0.000000e+00> : vector<8x8xf32>
    %177 = tpu.matmul %175, %176, %cst_47 {dimension_numbers = #tpu.dot_dimension_numbers<[1], [1], [0], [0], [0, 0, 1, 0], [], []>} : vector<8x8xf32>, vector<8x8xf32>, vector<8x8xf32> -> vector<8x8xf32>
    "tpu.trace_stop"() : () -> ()
    %178 = vector.broadcast %120 : vector<1x8xf32> to vector<8x8xf32>
    %179 = arith.addf %177, %178 : vector<8x8xf32>
    %cst_48 = arith.constant dense<0xFF800000> : vector<8xf32>
    %180 = vector.multi_reduction <maximumf>, %179, %cst_48 [1] : vector<8x8xf32> to vector<8xf32>
    %181 = vector.shape_cast %180 : vector<8xf32> to vector<8x1xf32>
    %182 = vector.broadcast %181 : vector<8x1xf32> to vector<8x8xf32>
    %183 = arith.subf %179, %182 : vector<8x8xf32>
    %184 = math.exp %183 : vector<8x8xf32>
    %cst_49 = arith.constant dense<0.000000e+00> : vector<8xf32>
    %185 = vector.multi_reduction <add>, %184, %cst_49 [1] : vector<8x8xf32> to vector<8xf32>
    %186 = vector.shape_cast %185 : vector<8xf32> to vector<8x1xf32>
    %187 = tpu.reciprocal %186 {approx = true} : vector<8x1xf32> -> vector<8x1xf32>
    %188 = vector.broadcast %187 : vector<8x1xf32> to vector<8x8xf32>
    %189 = arith.mulf %184, %188 : vector<8x8xf32>
    %190 = vector.extract_strided_slice %123 {offsets = [0, 24], sizes = [8, 8], strides = [1, 1]} : vector<8x32xf32> to vector<8x8xf32>
    %cst_50 = arith.constant dense<0.000000e+00> : vector<8x8xf32>
    %191 = tpu.matmul %189, %190, %cst_50 {dimension_numbers = #tpu.dot_dimension_numbers<[1], [0], [0], [1], [0, 0, 1, 1], [], []>} : vector<8x8xf32>, vector<8x8xf32>, vector<8x8xf32> -> vector<8x8xf32>
    %192 = tpu.concatenate %140, %157, %174, %191 in 1 : vector<8x8xf32>, vector<8x8xf32>, vector<8x8xf32>, vector<8x8xf32> -> vector<8x32xf32>
    %193 = tpu.concatenate %112, %192 in 0 : vector<8x32xf32>, vector<8x32xf32> -> vector<16x32xf32>
    %c0_51 = arith.constant 0 : index
    %c0_52 = arith.constant 0 : index
    %194 = vector.load %arg5[%c0_51, %c0_52] : memref<32x32xf32, #tpu.memory_space<vmem>>, vector<32x32xf32>
    %cst_53 = arith.constant dense<0.000000e+00> : vector<16x32xf32>
    %195 = tpu.matmul %193, %194, %cst_53 {dimension_numbers = #tpu.dot_dimension_numbers<[1], [0], [0], [1], [0, 0, 1, 1], [], []>} : vector<16x32xf32>, vector<32x32xf32>, vector<16x32xf32> -> vector<16x32xf32>
    %196 = arith.addf %1, %195 : vector<16x32xf32>
    %c0_54 = arith.constant 0 : index
    %c0_55 = arith.constant 0 : index
    %197 = vector.load %arg6[%c0_54, %c0_55] : memref<1x32xf32, #tpu.memory_space<vmem>>, vector<1x32xf32>
    %198 = vector.broadcast %197 : vector<1x32xf32> to vector<16x32xf32>
    %199 = arith.addf %196, %198 : vector<16x32xf32>
    %c0_56 = arith.constant 0 : index
    %c0_57 = arith.constant 0 : index
    %200 = vector.load %arg9[%c0_56, %c0_57] : memref<1x32xf32, #tpu.memory_space<vmem>>, vector<1x32xf32>
    %c0_58 = arith.constant 0 : index
    %c0_59 = arith.constant 0 : index
    %201 = vector.load %arg10[%c0_58, %c0_59] : memref<1x32xf32, #tpu.memory_space<vmem>>, vector<1x32xf32>
    %cst_60 = arith.constant dense<0.000000e+00> : vector<16xf32>
    %202 = vector.multi_reduction <add>, %199, %cst_60 [1] : vector<16x32xf32> to vector<16xf32>
    %203 = vector.shape_cast %202 : vector<16xf32> to vector<16x1xf32>
    %cst_61 = arith.constant 3.200000e+01 : f32
    %204 = vector.broadcast %cst_61 : f32 to vector<16x1xf32>
    %205 = arith.divf %203, %204 : vector<16x1xf32>
    %206 = vector.broadcast %205 : vector<16x1xf32> to vector<16x32xf32>
    %207 = arith.subf %199, %206 : vector<16x32xf32>
    %208 = arith.mulf %207, %207 : vector<16x32xf32>
    %cst_62 = arith.constant dense<0.000000e+00> : vector<16xf32>
    %209 = vector.multi_reduction <add>, %208, %cst_62 [1] : vector<16x32xf32> to vector<16xf32>
    %210 = vector.shape_cast %209 : vector<16xf32> to vector<16x1xf32>
    %cst_63 = arith.constant 3.200000e+01 : f32
    %211 = vector.broadcast %cst_63 : f32 to vector<16x1xf32>
    %212 = arith.divf %210, %211 : vector<16x1xf32>
    %213 = vector.broadcast %205 : vector<16x1xf32> to vector<16x32xf32>
    %214 = arith.subf %199, %213 : vector<16x32xf32>
    %cst_64 = arith.constant 9.99999974E-6 : f32
    %215 = vector.broadcast %cst_64 : f32 to vector<16x1xf32>
    %216 = arith.addf %212, %215 : vector<16x1xf32>
    %217 = math.rsqrt %216 : vector<16x1xf32>
    %218 = vector.broadcast %217 : vector<16x1xf32> to vector<16x32xf32>
    %219 = arith.mulf %214, %218 : vector<16x32xf32>
    %220 = vector.broadcast %200 : vector<1x32xf32> to vector<16x32xf32>
    %221 = arith.mulf %219, %220 : vector<16x32xf32>
    %222 = vector.broadcast %201 : vector<1x32xf32> to vector<16x32xf32>
    %223 = arith.addf %221, %222 : vector<16x32xf32>
    %c0_65 = arith.constant 0 : index
    %c0_66 = arith.constant 0 : index
    %224 = vector.load %arg11[%c0_65, %c0_66] : memref<32x128xf32, #tpu.memory_space<vmem>>, vector<32x128xf32>
    %cst_67 = arith.constant dense<0.000000e+00> : vector<16x128xf32>
    %225 = tpu.matmul %223, %224, %cst_67 {dimension_numbers = #tpu.dot_dimension_numbers<[1], [0], [0], [1], [0, 0, 1, 1], [], []>} : vector<16x32xf32>, vector<32x128xf32>, vector<16x128xf32> -> vector<16x128xf32>
    %c0_68 = arith.constant 0 : index
    %c0_69 = arith.constant 0 : index
    %226 = vector.load %arg12[%c0_68, %c0_69] : memref<1x128xf32, #tpu.memory_space<vmem>>, vector<1x128xf32>
    %227 = vector.broadcast %226 : vector<1x128xf32> to vector<16x128xf32>
    %228 = arith.addf %225, %227 : vector<16x128xf32>
    %cst_70 = arith.constant 0.000000e+00 : f32
    %229 = vector.broadcast %cst_70 : f32 to vector<16x128xf32>
    %230 = arith.maximumf %228, %229 : vector<16x128xf32>
    %c0_71 = arith.constant 0 : index
    %c0_72 = arith.constant 0 : index
    %231 = vector.load %arg13[%c0_71, %c0_72] : memref<128x32xf32, #tpu.memory_space<vmem>>, vector<128x32xf32>
    %cst_73 = arith.constant dense<0.000000e+00> : vector<16x32xf32>
    %232 = tpu.matmul %230, %231, %cst_73 {dimension_numbers = #tpu.dot_dimension_numbers<[1], [0], [0], [1], [0, 0, 1, 1], [], []>} : vector<16x128xf32>, vector<128x32xf32>, vector<16x32xf32> -> vector<16x32xf32>
    %c0_74 = arith.constant 0 : index
    %c0_75 = arith.constant 0 : index
    %233 = vector.load %arg14[%c0_74, %c0_75] : memref<1x32xf32, #tpu.memory_space<vmem>>, vector<1x32xf32>
    %234 = vector.broadcast %233 : vector<1x32xf32> to vector<16x32xf32>
    %235 = arith.addf %232, %234 : vector<16x32xf32>
    %236 = arith.addf %199, %235 : vector<16x32xf32>
    %237 = vector.extract_strided_slice %236 {offsets = [0, 0], sizes = [8, 32], strides = [1, 1]} : vector<16x32xf32> to vector<8x32xf32>
    %c0_76 = arith.constant 0 : index
    %c0_77 = arith.constant 0 : index
    %c0_78 = arith.constant 0 : index
    %238 = vector.load %arg15[%c0_76, %c0_77, %c0_78] : memref<2x8x32xf32, #tpu.memory_space<vmem>>, vector<1x8x32xf32>
    %239 = vector.shape_cast %238 : vector<1x8x32xf32> to vector<8x32xf32>
    %240 = vector.shape_cast %237 : vector<8x32xf32> to vector<1x8x32xf32>
    tpu.vector_store %arg15[%c0_76, %c0_77, %c0_78], %240 {strides = array<i32>} : memref<2x8x32xf32, #tpu.memory_space<vmem>>, vector<1x8x32xf32>,
    %241 = vector.extract_strided_slice %236 {offsets = [8, 0], sizes = [8, 32], strides = [1, 1]} : vector<16x32xf32> to vector<8x32xf32>
    %c1 = arith.constant 1 : index
    %c0_79 = arith.constant 0 : index
    %c0_80 = arith.constant 0 : index
    %242 = vector.load %arg15[%c1, %c0_79, %c0_80] : memref<2x8x32xf32, #tpu.memory_space<vmem>>, vector<1x8x32xf32>
    %243 = vector.shape_cast %242 : vector<1x8x32xf32> to vector<8x32xf32>
    %244 = vector.shape_cast %241 : vector<8x32xf32> to vector<1x8x32xf32>
    tpu.vector_store %arg15[%c1, %c0_79, %c0_80], %244 {strides = array<i32>} : memref<2x8x32xf32, #tpu.memory_space<vmem>>, vector<1x8x32xf32>,
    return
  }
  func.func @transform_0(%arg0: i32, %arg1: memref<4xi32, #tpu.memory_space<smem>>) -> (i32, i32, i32) {
    %c0_i32 = arith.constant 0 : i32
    %c0_i32_0 = arith.constant 0 : i32
    %c0_i32_1 = arith.constant 0 : i32
    return %arg0, %c0_i32, %c0_i32_0 : i32, i32, i32
  }
  func.func @transform_1(%arg0: i32, %arg1: memref<4xi32, #tpu.memory_space<smem>>) -> (i32, i32) {
    %c0_i32 = arith.constant 0 : i32
    %c0_i32_0 = arith.constant 0 : i32
    %c0_i32_1 = arith.constant 0 : i32
    return %c0_i32, %c0_i32_0 : i32, i32
  }
  func.func @transform_2(%arg0: i32, %arg1: memref<4xi32, #tpu.memory_space<smem>>) -> (i32, i32) {
    %c0_i32 = arith.constant 0 : i32
    %c0_i32_0 = arith.constant 0 : i32
    %c0_i32_1 = arith.constant 0 : i32
    return %c0_i32, %c0_i32_0 : i32, i32
  }
  func.func @transform_3(%arg0: i32, %arg1: memref<4xi32, #tpu.memory_space<smem>>) -> (i32, i32) {
    %c0_i32 = arith.constant 0 : i32
    %c0_i32_0 = arith.constant 0 : i32
    %c0_i32_1 = arith.constant 0 : i32
    return %c0_i32, %c0_i32_0 : i32, i32
  }
  func.func @transform_4(%arg0: i32, %arg1: memref<4xi32, #tpu.memory_space<smem>>) -> (i32, i32) {
    %c0_i32 = arith.constant 0 : i32
    %c0_i32_0 = arith.constant 0 : i32
    %c0_i32_1 = arith.constant 0 : i32
    return %c0_i32, %c0_i32_0 : i32, i32
  }
  func.func @transform_5(%arg0: i32, %arg1: memref<4xi32, #tpu.memory_space<smem>>) -> (i32, i32) {
    %c0_i32 = arith.constant 0 : i32
    %c0_i32_0 = arith.constant 0 : i32
    %c0_i32_1 = arith.constant 0 : i32
    return %c0_i32, %c0_i32_0 : i32, i32
  }
  func.func @transform_6(%arg0: i32, %arg1: memref<4xi32, #tpu.memory_space<smem>>) -> (i32, i32) {
    %c0_i32 = arith.constant 0 : i32
    %c0_i32_0 = arith.constant 0 : i32
    %c0_i32_1 = arith.constant 0 : i32
    return %c0_i32, %c0_i32_0 : i32, i32
  }
  func.func @transform_7(%arg0: i32, %arg1: memref<4xi32, #tpu.memory_space<smem>>) -> (i32, i32) {
    %c0_i32 = arith.constant 0 : i32
    %c0_i32_0 = arith.constant 0 : i32
    %c0_i32_1 = arith.constant 0 : i32
    return %c0_i32, %c0_i32_0 : i32, i32
  }
  func.func @transform_8(%arg0: i32, %arg1: memref<4xi32, #tpu.memory_space<smem>>) -> (i32, i32) {
    %c0_i32 = arith.constant 0 : i32
    %c0_i32_0 = arith.constant 0 : i32
    %c0_i32_1 = arith.constant 0 : i32
    return %c0_i32, %c0_i32_0 : i32, i32
  }
  func.func @transform_9(%arg0: i32, %arg1: memref<4xi32, #tpu.memory_space<smem>>) -> (i32, i32) {
    %c0_i32 = arith.constant 0 : i32
    %c0_i32_0 = arith.constant 0 : i32
    %c0_i32_1 = arith.constant 0 : i32
    return %c0_i32, %c0_i32_0 : i32, i32
  }
  func.func @transform_10(%arg0: i32, %arg1: memref<4xi32, #tpu.memory_space<smem>>) -> (i32, i32) {
    %c0_i32 = arith.constant 0 : i32
    %c0_i32_0 = arith.constant 0 : i32
    %c0_i32_1 = arith.constant 0 : i32
    return %c0_i32, %c0_i32_0 : i32, i32
  }
  func.func @transform_11(%arg0: i32, %arg1: memref<4xi32, #tpu.memory_space<smem>>) -> (i32, i32) {
    %c0_i32 = arith.constant 0 : i32
    %c0_i32_0 = arith.constant 0 : i32
    %c0_i32_1 = arith.constant 0 : i32
    return %c0_i32, %c0_i32_0 : i32, i32
  }
  func.func @transform_12(%arg0: i32, %arg1: memref<4xi32, #tpu.memory_space<smem>>) -> (i32, i32) {
    %c0_i32 = arith.constant 0 : i32
    %c0_i32_0 = arith.constant 0 : i32
    %c0_i32_1 = arith.constant 0 : i32
    return %c0_i32, %c0_i32_0 : i32, i32
  }
  func.func @transform_13(%arg0: i32, %arg1: memref<4xi32, #tpu.memory_space<smem>>) -> (i32, i32, i32) {
    %c0_i32 = arith.constant 0 : i32
    %c0_i32_0 = arith.constant 0 : i32
    %c0_i32_1 = arith.constant 0 : i32
    return %arg0, %c0_i32, %c0_i32_0 : i32, i32, i32
  }
}

</mosaic_0001>

<bundles_post_ra>
// kernel: tpu_custom_call.1
= control target key start
LH: loop header
LB: loop body
LE: loop exit
PB: predicated region body
PF: predicated region fallthrough
CT: control target
= control target key end

     0   :  { %s3366_s0 = inlined_call_operand.vmem [shape: s32[4], index: 0, kind: input, shape index: {}]   ;;  %s3367_s1 = inlined_call_operand.vmem [shape: f32[4,8,32], index: 1, kind: input, shape index: {}]   ;;  %s3368_s2 = inlined_call_operand.vmem [shape: f32[32,96], index: 2, kind: input, shape index: {}]   ;;  %s3369_s3 = inlined_call_operand.vmem [shape: f32[1,96], index: 3, kind: input, shape index: {}]   ;;  %s3370_s4 = inlined_call_operand.vmem [shape: f32[32,32], index: 4, kind: input, shape index: {}]   ;;  %s3371_s5 = inlined_call_operand.vmem [shape: f32[1,32], index: 5, kind: input, shape index: {}]   ;;  %s3372_s6 = inlined_call_operand.vmem [shape: f32[1,32], index: 6, kind: input, shape index: {}]   ;;  %s3373_s7 = inlined_call_operand.vmem [shape: f32[1,32], index: 7, kind: input, shape index: {}]   ;;  %s3374_s8 = inlined_call_operand.vmem [shape: f32[1,32], index: 8, kind: input, shape index: {}]   ;;  %s3375_s9 = inlined_call_operand.vmem [shape: f32[1,32], index: 9, kind: input, shape index: {}]   ;;  %s3376_s10 = inlined_call_operand.vmem [shape: f32[32,128], index: 10, kind: input, shape index: {}]   ;;  %s3377_s11 = inlined_call_operand.vmem [shape: f32[1,128], index: 11, kind: input, shape index: {}]   ;;  %s3378_s12 = inlined_call_operand.vmem [shape: f32[128,32], index: 12, kind: input, shape index: {}]   ;;  %s3379_s13 = inlined_call_operand.vmem [shape: f32[1,32], index: 13, kind: input, shape index: {}]   ;;  %s3380_s14 = inlined_call_operand.hbm [shape: f32[4,8,32], index: 14, kind: output, shape index: {}]  }
   0x1   :  { %3383 = sst [smem:[#allocation8_spill]] %s3367_s1  ;;  %s19_s15 = sshll.u32 %s3366_s0, 4  ;;  %s20_s15 = int_to_ptr.vmem [resolvable:$true] %s19_s15 }
   0x2   :  { %3384 = sst [smem:[#allocation9_spill]] %s3368_s2  ;;  %s2788_s16 = scalar_lea.vmem %s20_s15, 16 }
   0x3   :  { %3385 = sst [smem:[#allocation10_spill]] %s3369_s3  ;;  %p2789_p0 = scmp.ne.s32.totalorder %s20_s15, %s2788_s16 }
   0x4   :  { %3386 = sst [smem:[#allocation11_spill]] %s3370_s4  ;;  %p2793_p1 = scmp.lt.s32.totalorder %s20_s15, %s20_s15 }
   0x5   :  { %p2794_p2 = scmp.lt.s32.totalorder %s2788_s16, %s2788_s16 }
   0x7   :  { %p2795_p3 = por %p2794_p2, %p2793_p1 }
   0x9   :  { %p2796_p4 = pnand %p2795_p3, %p2789_p0 }
   0xb   :  { %2799 = shalt.err (!%p2796_p4)  }
   0xc   :  { %s2866_s17 = smov [#allocation3]  }
   0xd   :  { %22 = dma.vmem_to_smem %s20_s15, 16, %s2866_s17, [#allocation2] }
   0xe   :  { %2844 = dma.done.wait [#allocation2], 16 }
   0xf   :  { %2845 = vsyncadd [#allocation2], 4294967280 }
  0x10   :  { %24 = sfence }
  0x11   :  { %25 = vsyncpa [#allocation5], 0 }
  0x12   :  { %27 = vsyncpa [#allocation5 + $0x1], 0  ;;  %s2964_s18 = smov 0   ;;  %s2966_s19 = smov 0  }
  0x13   :  { %s2968_s0 = smov 0   ;;  %s2970_s20 = smov 0  }
  0x14 LB: > { %s2985_s21 = sadd.s32 4294967295, %s2864_s20   ;;  %s2365_s22 = sadd.s32 4294967294, %s2864_s20   ;;  %s2864_s20 = sphi %s2970_s20, %s3397_s20   ;;  %s2860_s0 = sphi %s2968_s0, %s3396_s0   ;;  %s2856_s19 = sphi %s2966_s19, %s3395_s19   ;;  %s2852_s18 = sphi %s2964_s18, %s3394_s18  }
  0x15   : > { %s2989_s23 = sadd.s32 1, %s2864_s20   ;;  %s318_s24 = sadd.s32 1, %s2860_s0 }
  0x16   : > { %s315_s25 = ssub.s32 %s2864_s20, %s2989_s23  ;;  %p328_p5 = scmp.ne.s32.totalorder %s2860_s0, %s2856_s19 }
  0x17   : > { %p316_p6 = scmp.eq.s32.totalorder %s315_s25, 0  ;;  %p329_p7 = scmp.eq.s32.totalorder %s2985_s21, 1 }
  0x18   : > { %p334_p8 = scmp.ne.s32.totalorder %s2856_s19, %s2852_s18  ;;  %p335_p9 = scmp.eq.s32.totalorder %s2365_s22, 1 }
  0x19   : > { %s3000_s26 = scalar_select %p316_p6, %s2860_s0, %s318_s24  }
  0x1a   : > { %p3002_p10 = por %p329_p7, %p328_p5  ;;  %p3006_p11 = por %p335_p9, %p334_p8 }
  0x1b   : > { %p2368_p12 = scmp.ge.s32.totalorder %s2864_s20, 1  ;;  %p398_p13 = scmp.lt.s32.totalorder %s2864_s20, 3 }
  0x1d   : > { %p399_p0 = pnand %p2368_p12, %p398_p13 }
  0x1e   : > { %s3013_s29 = sshll.u32 (!%p399_p0), %s2985_s21, 1  ;;  %vm453_vm0 = vcmask (!%p399_p0), 261120   ;;  %s3389_s1 = sld [smem:[#allocation8_spill]] (!%p399_p0)  ;;  %v2372_v27 = vld [vmem:[%s3372_s6] ss:$0 sm:$0xff] (!%p399_p0)  ;;  %v2867_v36 = vmov (!%p399_p0), 0.0   ;;  %v589_v56 = vlaneseq (!%p399_p0) }
  0x1f   : > { %402 = sbr.rel (%p399_p0) target bundleno = 2606 (0xa2e), region = 72  ;;  %p443_p1 = scmp.lt.s32.totalorder (!%p399_p0), %s3013_s29, 3  ;;  %v2373_v29 = vld [vmem:[%s3373_s7] ss:$0 sm:$0xff] (!%p399_p0)  ;;  %2507 = vmatprep.subr.mxu0 (!%p399_p0), %v2867_v36  ;;  %vm2868_vm1 = vmmov (!%p399_p0), 0   ;;  %vm599_vm2 = vcmask (!%p399_p0), 64512  }
  0x20   : > { %s3390_s2 = sld [smem:[#allocation9_spill]] (!%p399_p0)  ;;  %2509 = vmatprep.mubr.msk.f32.mxu0 (!%p399_p0), %vm2868_vm1, %v2867_v36  ;;  %s3391_s3 = sld [smem:[#allocation10_spill]] (!%p399_p0)  ;;  %v590_v57 = vand.u32 (!%p399_p0), 127, %v589_v56  ;;  %v2876_v59 = vmov (!%p399_p0), -1e+09   ;;  %vm1269_vm5 = vcmask (!%p399_p0), 130048  }
  0x21   : > { %s2869_s17 = smov (!%p399_p0), 88   ;;  %s2871_s24 = smov (!%p399_p0), 120   ;;  %vm1271_vm6 = vcmask (!%p399_p0), 195584  }
  0x22   : > { %s2872_s25 = smov (!%p399_p0), 112   ;;  %s592_s16 = sld [smem:[#allocation3 + %s3013_s29]] (!%p399_p0) }
  0x23   : > { %s3392_s4 = sld [smem:[#allocation11_spill]] (!%p399_p0) }
  0x26   : > { %s444_s30 = scalar_select %p443_p1, %s3013_s29, 3  ;;  %v497_v14 = vld [vmem:[%s3390_s2] sm:$0xff]  ;;  %v498_v15 = vld [vmem:[%s3390_s2 + $0x8] sm:$0xff]  ;;  %v499_v16 = vld [vmem:[%s3390_s2 + $0x10] sm:$0xff] }
  0x27   : > { %v2634_v17 = vpack.c.bf16 %v498_v15, %v497_v14  ;;  %v500_v18 = vld [vmem:[%s3390_s2 + $0x18] sm:$0xff]  ;;  %v2374_v37 = vld [vmem:[%s3391_s3] ss:$0 sm:$0xff] }
  0x28   : > { %s2371_s15 = sshll.u32 %s444_s30, 3  ;;  %v2638_v19 = vpack.c.bf16 %v500_v18, %v499_v16  ;;  %s2874_s30 = smov 104   ;;  %v593_v58 = vstv %s592_s16 }
  0x29   : > { %s446_s22 = scalar_lea.vmem %s3389_s1, %s2371_s15  ;;  %2635 = vmatprep.subr.bf16.mxu1 %v2634_v17  ;;  %s2873_s1 = smov 80   ;;  %vm594_vm3 = vcmp.lt.s32.totalorder %v590_v57, %v593_v58 }
  0x2a   : > { %v3020_v0 = vld [vmem:[%s446_s22] sm:$0xff]  ;;  %v3022_v1 = vld [vmem:[%s446_s22 + $0x8] sm:$0xff]  ;;  %2637 = vmatpush3.bf16.msra.mxu1 %v2634_v17  ;;  %s2870_s22 = smov 96   ;;  %s2875_s15 = smov 72   ;;  %v595_v60 = vsel %vm594_vm3, 0.0, %v2876_v59 }
  0x2b   : > { %v454_v2 = vsel %vm453_vm0, %v3020_v0, 0.0  ;;  %v457_v3 = vsel %vm453_vm0, %v3022_v1, 0.0  ;;  %2639 = vmatprep.subr.bf16.mxu1 %v2638_v19  ;;  %s3393_s16 = smov 8  }
  0x2c   : > { %455 = vadd.xlane.f32.xlu0 %v454_v2 }
  0x2e   : > { %2641 = vmatpush3.bf16.msra.mxu1 %v2638_v19 }
  0x2f   : > { %2497 = vmatprep.subr.mxu1 %v2867_v36 }
  0x30   : > { %458 = vadd.xlane.f32.xlu0 %v457_v3 }
  0xb9   : > { %v456_v4 = vpop.xlane.xlu0 %455 }
  0xba   : > { %v461_v5 = vmul.f32 0.03125, %v456_v4 }
  0xbc   : > { %v463_v6 = vsub.f32 %v3020_v0, %v461_v5 }
  0xbd   : > { %v459_v7 = vpop.xlane.xlu0 %458 }
  0xbe   : > { %v462_v8 = vmul.f32 0.03125, %v459_v7  ;;  %v465_v9 = vmul.f32 %v463_v6, %v463_v6 }
  0xc0   : > { %v464_v10 = vsub.f32 %v3022_v1, %v462_v8  ;;  %v467_v11 = vsel %vm453_vm0, %v465_v9, 0.0 }
  0xc1   : > { %468 = vadd.xlane.f32.xlu1 %v467_v11 }
  0xc2   : > { %v466_v12 = vmul.f32 %v464_v10, %v464_v10 }
  0xc4   : > { %v470_v13 = vsel %vm453_vm0, %v466_v12, 0.0 }
  0xc5   : > { %471 = vadd.xlane.f32.xlu1 %v470_v13 }
 0x14e   : > { %v469_v20 = vpop.xlane.xlu1 %468 }
 0x14f   : > { %v473_v21 = vmul.f32 0.03125, %v469_v20 }
 0x151   : > { %v475_v22 = vadd.f32 1e-05, %v473_v21 }
 0x152   : > { %v472_v23 = vpop.xlane.xlu1 %471 }
 0x153   : > { %2748 = vrsqrt.f32 %v475_v22  ;;  %v474_v24 = vmul.f32 0.03125, %v472_v23 }
 0x155   : > { %v476_v25 = vadd.f32 1e-05, %v474_v24 }
 0x157   : > { %2750 = vrsqrt.f32 %v476_v25 }
 0x15d   : > { %v2749_v26 = vpop.eup %2748 }
 0x15e   : > { %v479_v28 = vmul.f32 %v2749_v26, %v463_v6 }
 0x160   : > { %v487_v30 = vmul.f32 %v2372_v27, %v479_v28 }
 0x161   : > { %v2751_v31 = vpop.eup %2750 }
 0x162   : > { %v480_v32 = vmul.f32 %v2751_v31, %v464_v10  ;;  %v495_v33 = vadd.f32 %v2373_v29, %v487_v30 }
 0x164   : > { %v488_v34 = vmul.f32 %v2372_v27, %v480_v32  ;;  %2494 = vmatprep.mubr.msk.f32.mxu1 %vm453_vm0, %v495_v33 }
 0x166   : > { %v496_v35 = vadd.f32 %v2373_v29, %v488_v34 }
 0x168   : > { %2495 = vmatmul.mubr.msk.f32.vlgmr.msra.gmra.mrb[0].mxu1 %vm453_vm0, %v496_v35 }
 0x169   : > { %2499 = vmatprep.mubr.msk.f32.mxu1 %vm2868_vm1, %v2867_v36 }
 0x23b   : > { %v2496_v38 = vpop.f32.mrb[0].mxu1 }
 0x23c   : > { %v580_v39 = vpop.f32.mrb[1].mxu1  ;;  %v3069_v41 = vadd.f32 %v2496_v38, %v2374_v37 }
 0x23d   : > { %v3061_v40 = vadd.f32 %v2374_v37, %v580_v39 }
 0x23f   : > { %763 = vrot.lane.b32.xlu1 %v3061_v40, %s2869_s17  ;;  %597 = vrot.lane.b32.xlu0 %v3061_v40, %s2870_s22 }
 0x243   : > { %761 = vrot.lane.b32.xlu1 %v3061_v40, %s2871_s24  ;;  %926 = vrot.lane.b32.xlu0 %v3061_v40, %s2872_s25 }
 0x247   : > { %928 = vrot.lane.b32.xlu1 %v3061_v40, %s2873_s1  ;;  %1091 = vrot.lane.b32.xlu0 %v3061_v40, %s2874_s30 }
 0x24b   : > { %1093 = vrot.lane.b32.xlu1 %v3061_v40, %s2875_s15  ;;  %1444 = vrot.lane.b32.xlu0 %v3069_v41, %s2869_s17  ;;  %s1273_s17 = sadd.s32 1, %s3013_s29  ;;  %s2877_s29 = smov 64  }
 0x24f   : > { %1279 = vrot.lane.b32.xlu1 %v3069_v41, %s2870_s22  ;;  %1609 = vrot.lane.b32.xlu0 %v3069_v41, %s2873_s1  ;;  %s1274_s22 = sld [smem:[#allocation3 + %s1273_s17]]  ;;  %s2880_s1 = smov 56  }
 0x253   : > { %1442 = vrot.lane.b32.xlu1 %v3069_v41, %s2871_s24  ;;  %1774 = vrot.lane.b32.xlu0 %v3069_v41, %s2875_s15  ;;  %s2878_s24 = smov 48   ;;  %s2883_s15 = smov 24  }
 0x255   : > { %v1275_v8 = vstv %s1274_s22  ;;  %s2884_s22 = smov [#allocation4]  }
 0x256   : > { %vm1276_vm4 = vcmp.lt.s32.totalorder %v590_v57, %v1275_v8 }
 0x257   : > { %1607 = vrot.lane.b32.xlu1 %v3069_v41, %s2872_s25  ;;  %v1277_v15 = vsel %vm1276_vm4, 0.0, %v2876_v59  ;;  %s2879_s25 = smov 40  }
 0x25b   : > { %1772 = vrot.lane.b32.xlu1 %v3069_v41, %s2874_s30  ;;  %s3381_s30 = smov 8  }
 0x2b1   : > { %v764_v42 = vpop.permute.xlu1 %763  ;;  %v598_v43 = vpop.permute.xlu0 %597 }
 0x2b2   : > { %2498 = vmatpush3.xpose.msk.msra.mxu1 %vm599_vm2, %v598_v43  ;;  %2508 = vmatpush3.xpose.msk.msra.mxu0 %vm599_vm2, %v764_v42 }
 0x2b3   : > { %2517 = vmatprep.subr.mxu0 %v2867_v36  ;;  %2502 = vmatprep.subr.mxu1 %v2867_v36 }
 0x2b5   : > { %v762_v44 = vpop.permute.xlu1 %761  ;;  %2500 = vmatmul.mubr.msk.f32.vlgmr.msra.gmra.mrb[2].mxu1 %vm599_vm2, %v3061_v40  ;;  %v927_v45 = vpop.permute.xlu0 %926 }
 0x2b6   : > { %2510 = vmatmul.mubr.msk.f32.vlgmr.msra.gmra.mrb[0].mxu0 %vm599_vm2, %v762_v44  ;;  %2504 = vmatprep.mubr.msk.f32.mxu1 %vm2868_vm1, %v2867_v36 }
 0x2b7   : > { %2519 = vmatprep.mubr.msk.f32.mxu0 %vm2868_vm1, %v2867_v36 }
 0x2b9   : > { %v929_v46 = vpop.permute.xlu1 %928  ;;  %v1092_v47 = vpop.permute.xlu0 %1091 }
 0x2ba   : > { %2518 = vmatpush3.xpose.msk.msra.mxu0 %vm599_vm2, %v929_v46 }
 0x2bb   : > { %2527 = vmatprep.subr.mxu0 %v2867_v36 }
 0x2bd   : > { %v1094_v48 = vpop.permute.xlu1 %1093  ;;  %2520 = vmatmul.mubr.msk.f32.vlgmr.msra.gmra.mrb[2].mxu0 %vm599_vm2, %v927_v45  ;;  %v1445_v49 = vpop.permute.xlu0 %1444 }
 0x2be   : > { %2528 = vmatpush3.xpose.msk.msra.mxu0 %vm599_vm2, %v1094_v48  ;;  %2529 = vmatprep.mubr.msk.f32.mxu0 %vm2868_vm1, %v2867_v36 }
 0x2bf   : > { %2537 = vmatprep.subr.mxu0 %v2867_v36 }
 0x2c1   : > { %v1280_v50 = vpop.permute.xlu1 %1279  ;;  %2530 = vmatmul.mubr.msk.f32.vlgmr.msra.gmra.mrb[4].mxu0 %vm599_vm2, %v1092_v47  ;;  %v1610_v52 = vpop.permute.xlu0 %1609 }
 0x2c2   : > { %2538 = vmatpush3.xpose.msk.msra.mxu0 %vm599_vm2, %v1280_v50  ;;  %2539 = vmatprep.mubr.msk.f32.mxu0 %vm2868_vm1, %v2867_v36 }
 0x2c3   : > { %2547 = vmatprep.subr.mxu0 %v2867_v36 }
 0x2c5   : > { %v1443_v51 = vpop.permute.xlu1 %1442  ;;  %2540 = vmatmul.mubr.msk.f32.vlgmr.msra.gmra.mrb[6].mxu0 %vm599_vm2, %v3069_v41  ;;  %v1775_v54 = vpop.permute.xlu0 %1774 }
 0x2c6   : > { %2548 = vmatpush3.xpose.msk.msra.mxu0 %vm599_vm2, %v1445_v49  ;;  %2549 = vmatprep.mubr.msk.f32.mxu0 %vm2868_vm1, %v2867_v36 }
 0x2c7   : > { %2557 = vmatprep.subr.mxu0 %v2867_v36 }
 0x2c9   : > { %2550 = vmatmul.mubr.msk.f32.vlgmr.msra.gmra.mrb[8].mxu0 %vm599_vm2, %v1443_v51  ;;  %v1608_v53 = vpop.permute.xlu1 %1607 }
 0x2ca   : > { %2558 = vmatpush3.xpose.msk.msra.mxu0 %vm599_vm2, %v1610_v52  ;;  %2559 = vmatprep.mubr.msk.f32.mxu0 %vm2868_vm1, %v2867_v36 }
 0x2cb   : > { %2567 = vmatprep.subr.mxu0 %v2867_v36 }
 0x2cd   : > { %2560 = vmatmul.mubr.msk.f32.vlgmr.msra.gmra.mrb[10].mxu0 %vm599_vm2, %v1608_v53  ;;  %v1773_v55 = vpop.permute.xlu1 %1772 }
 0x2ce   : > { %2568 = vmatpush3.xpose.msk.msra.mxu0 %vm599_vm2, %v1775_v54  ;;  %2569 = vmatprep.mubr.msk.f32.mxu0 %vm2868_vm1, %v2867_v36 }
 0x2d1   : > { %2570 = vmatmul.mubr.msk.f32.vlgmr.msra.gmra.mrb[12].mxu0 %vm599_vm2, %v1773_v55 }
 0x388   : > { %v670_v61 = vpop.f32.mrb[2].mxu1 }
 0x389   : > { %v671_v62 = vadd.f32 %v670_v61, %v595_v60  ;;  %v2501_v63 = vpop.f32.mrb[3].mxu1  ;;  %v835_v2 = vpop.f32.mrb[0].mxu0 }
 0x38a   : > { %v836_v3 = vadd.f32 %v835_v2, %v595_v60  ;;  %v2511_v4 = vpop.f32.mrb[1].mxu0 }
 0x38b   : > { %v674_v5 = vsel %vm599_vm2, %v671_v62, -inf }
 0x38c   : > { %675 = vmax.xlane.f32.xlu0 %v674_v5  ;;  %v839_v6 = vsel %vm599_vm2, %v836_v3, -inf }
 0x38d   : > { %840 = vmax.xlane.f32.xlu1 %v839_v6 }
 0x390   : > { %v1000_v7 = vpop.f32.mrb[2].mxu0 }
 0x391   : > { %v3122_v9 = vadd.f32 %v1000_v7, %v595_v60  ;;  %v2521_v10 = vpop.f32.mrb[3].mxu0 }
 0x393   : > { %v1004_v11 = vsel %vm599_vm2, %v3122_v9, -inf }
 0x394   : > { %1005 = vmax.xlane.f32.xlu0 %v1004_v11  ;;  %v1165_v12 = vpop.f32.mrb[4].mxu0 }
 0x395   : > { %v1166_v13 = vadd.f32 %v1165_v12, %v595_v60  ;;  %v2531_v14 = vpop.f32.mrb[5].mxu0 }
 0x397   : > { %v1169_v16 = vsel %vm599_vm2, %v1166_v13, -inf }
 0x398   : > { %1170 = vmax.xlane.f32.xlu0 %v1169_v16  ;;  %v1351_v17 = vpop.f32.mrb[6].mxu0 }
 0x399   : > { %v1352_v18 = vadd.f32 %v1351_v17, %v1277_v15  ;;  %v2541_v19 = vpop.f32.mrb[7].mxu0 }
 0x39b   : > { %v1355_v20 = vsel %vm599_vm2, %v1352_v18, -inf }
 0x39c   : > { %1356 = vmax.xlane.f32.xlu0 %v1355_v20  ;;  %v1516_v21 = vpop.f32.mrb[8].mxu0 }
 0x39d   : > { %v1517_v22 = vadd.f32 %v1516_v21, %v1277_v15  ;;  %v2551_v23 = vpop.f32.mrb[9].mxu0 }
 0x39f   : > { %v1520_v24 = vsel %vm599_vm2, %v1517_v22, -inf }
 0x3a0   : > { %1521 = vmax.xlane.f32.xlu1 %v1520_v24  ;;  %v1681_v25 = vpop.f32.mrb[10].mxu0 }
 0x3a1   : > { %v1682_v26 = vadd.f32 %v1681_v25, %v1277_v15  ;;  %v2561_v27 = vpop.f32.mrb[11].mxu0 }
 0x3a3   : > { %v1685_v28 = vsel %vm599_vm2, %v1682_v26, -inf }
 0x3a4   : > { %1686 = vmax.xlane.f32.xlu0 %v1685_v28  ;;  %v1846_v29 = vpop.f32.mrb[12].mxu0 }
 0x3a5   : > { %v2571_v30 = vpop.f32.mrb[13].mxu0  ;;  %v1847_v31 = vadd.f32 %v1846_v29, %v1277_v15 }
 0x3a7   : > { %v1850_v32 = vsel %vm599_vm2, %v1847_v31, -inf }
 0x3b1   : > { %685 = vrot.lane.b32.xlu1 %v3061_v40, %s2877_s29 }
 0x3d5   : > { %1851 = vmax.xlane.f32.xlu1 %v1850_v32 }
 0x3e6   : > { %1015 = vrot.lane.b32.xlu1 %v3061_v40, %s2878_s24 }
 0x3ea   : > { %1180 = vrot.lane.b32.xlu1 %v3061_v40, %s2879_s25 }
 0x3ee   : > { %1366 = vrot.lane.b32.xlu1 %v3069_v41, %s2877_s29  ;;  %s2882_s29 = smov 16  }
 0x419   : > { %v676_v33 = vpop.xlane.xlu0 %675 }
 0x41a   : > { %v677_v34 = vsub.f32 %v671_v62, %v676_v33  ;;  %v841_v35 = vpop.xlane.xlu1 %840 }
 0x41b   : > { %v842_v37 = vsub.f32 %v836_v3, %v841_v35 }
 0x41c   : > { %v678_v38 = vmul.f32 1.442695, %v677_v34 }
 0x41d   : > { %v843_v39 = vmul.f32 1.442695, %v842_v37 }
 0x41e   : > { %2752 = vpow2.f32 %v678_v38 }
 0x41f   : > { %2754 = vpow2.f32 %v843_v39 }
 0x421   : > { %v1006_v42 = vpop.xlane.xlu0 %1005 }
 0x422   : > { %v1007_v54 = vsub.f32 %v3122_v9, %v1006_v42 }
 0x424   : > { %v1008_v56 = vmul.f32 1.442695, %v1007_v54 }
 0x425   : > { %v1171_v43 = vpop.xlane.xlu0 %1170 }
 0x426   : > { %v1172_v44 = vsub.f32 %v1166_v13, %v1171_v43 }
 0x428   : > { %v2753_v45 = vpop.eup %2752  ;;  %v1173_v46 = vmul.f32 1.442695, %v1172_v44 }
 0x429   : > { %v3137_v47 = vpop.eup %2754  ;;  %v680_v48 = vsel %vm599_vm2, %v2753_v45, 0.0  ;;  %v1357_v55 = vpop.xlane.xlu0 %1356 }
 0x42a   : > { %2756 = vpow2.f32 %v1173_v46  ;;  %681 = vadd.xlane.f32.xlu0 %v680_v48  ;;  %v845_v49 = vsel %vm599_vm2, %v3137_v47, 0.0  ;;  %v1358_v57 = vsub.f32 %v1352_v18, %v1357_v55  ;;  %v1954_v55 = vld [vmem:[%s3392_s4 + $0x10] sm:$0xff] }
 0x42b   : > { %846 = vadd.xlane.f32.xlu1 %v845_v49  ;;  %2758 = vpow2.f32 %v1008_v56  ;;  %v1955_v56 = vld [vmem:[%s3392_s4 + $0x18] sm:$0xff] }
 0x42c   : > { %v1359_v59 = vmul.f32 1.442695, %v1358_v57 }
 0x42d   : > { %v1522_v50 = vpop.xlane.xlu1 %1521 }
 0x42e   : > { %2760 = vpow2.f32 %v1359_v59  ;;  %v1523_v61 = vsub.f32 %v1517_v22, %v1522_v50 }
 0x430   : > { %v1524_v63 = vmul.f32 1.442695, %v1523_v61 }
 0x431   : > { %v686_v51 = vpop.permute.xlu1 %685  ;;  %v1687_v58 = vpop.xlane.xlu0 %1686 }
 0x432   : > { %2503 = vmatpush3.msra.mxu1 %v686_v51  ;;  %v1688_v60 = vsub.f32 %v1682_v26, %v1687_v58  ;;  %v1952_v51 = vld [vmem:[%s3392_s4] sm:$0xff]  ;;  %v2646_v58 = vpack.c.bf16 %v1955_v56, %v1954_v55  ;;  %v2196_v56 = vld [vmem:[%s3378_s12 + $0x50] sm:$0xff] }
 0x433   : > { %2512 = vmatprep.subr.mxu1 %v2867_v36 }
 0x434   : > { %v3143_v52 = vpop.eup %2756  ;;  %v1689_v62 = vmul.f32 1.442695, %v1688_v60 }
 0x435   : > { %v1175_v53 = vsel %vm599_vm2, %v3143_v52, 0.0  ;;  %v2759_v2 = vpop.eup %2758 }
 0x436   : > { %1176 = vadd.xlane.f32.xlu1 %v1175_v53  ;;  %2762 = vpow2.f32 %v1689_v62 }
 0x437   : > { %2764 = vpow2.f32 %v1524_v63 }
 0x438   : > { %v2761_v3 = vpop.eup %2760 }
 0x439   : > { %v1361_v5 = vsel %vm599_vm2, %v2761_v3, 0.0 }
 0x440   : > { %850 = vrot.lane.b32.xlu0 %v3061_v40, %s2880_s1  ;;  %v1010_v40 = vsel %vm599_vm2, %v2759_v2, 0.0  ;;  %v3152_v6 = vpop.eup %2762 }
 0x441   : > { %v1691_v9 = vsel %vm599_vm2, %v3152_v6, 0.0  ;;  %v2765_v10 = vpop.eup %2764 }
 0x442   : > { %v1526_v11 = vsel %vm599_vm2, %v2765_v10, 0.0 }
 0x447   : > { %1531 = vrot.lane.b32.xlu1 %v3069_v41, %s2880_s1 }
 0x45f   : > { %1011 = vadd.xlane.f32.xlu0 %v1010_v40 }
 0x462   : > { %v1852_v4 = vpop.xlane.xlu1 %1851 }
 0x463   : > { %v1853_v7 = vsub.f32 %v1847_v31, %v1852_v4  ;;  %1362 = vadd.xlane.f32.xlu0 %v1361_v5 }
 0x465   : > { %v1854_v8 = vmul.f32 1.442695, %v1853_v7 }
 0x466   : > { %v1016_v14 = vpop.permute.xlu1 %1015 }
 0x467   : > { %2766 = vpow2.f32 %v1854_v8  ;;  %1692 = vadd.xlane.f32.xlu0 %v1691_v9 }
 0x46a   : > { %v1181_v15 = vpop.permute.xlu1 %1180 }
 0x46b   : > { %1527 = vadd.xlane.f32.xlu1 %v1526_v11 }
 0x46e   : > { %v1367_v16 = vpop.permute.xlu1 %1366 }
 0x471   : > { %v3157_v12 = vpop.eup %2766 }
 0x472   : > { %v1856_v13 = vsel %vm599_vm2, %v3157_v12, 0.0 }
 0x473   : > { %1857 = vadd.xlane.f32.xlu0 %v1856_v13 }
 0x47c   : > { %1861 = vrot.lane.b32.xlu1 %v3069_v41, %s2879_s25 }
 0x489   : > { %1696 = vrot.lane.b32.xlu0 %v3069_v41, %s2878_s24  ;;  %s2417_s24 = sshll.u32 %s2985_s21, 8 }
 0x4b7   : > { %v682_v17 = vpop.xlane.xlu0 %681 }
 0x4b8   : > { %2768 = vrcp.f32 %v682_v17  ;;  %v847_v18 = vpop.xlane.xlu1 %846 }
 0x4b9   : > { %2770 = vrcp.f32 %v847_v18  ;;  %v2404_v18 = vld [vmem:[%s3371_s5] ss:$0 sm:$0xff] }
 0x4bb   : > { %v851_v22 = vpop.permute.xlu0 %850 }
 0x4c2   : > { %v2769_v19 = vpop.eup %2768 }
 0x4c3   : > { %v684_v20 = vmul.f32 %v2769_v19, %v2753_v45  ;;  %v2771_v21 = vpop.eup %2770  ;;  %v1177_v41 = vpop.xlane.xlu1 %1176 }
 0x4c4   : > { %v849_v23 = vmul.f32 %v2771_v21, %v3137_v47 }
 0x4c5   : > { %2505 = vmatmul.mubr.msk.f32.vlgmr.msra.gmra.mrb[4].mxu1 %vm599_vm2, %v684_v20 }
 0x4c6   : > { %2513 = vmatpush3.msra.mxu1 %v851_v22  ;;  %2514 = vmatprep.mubr.msk.f32.mxu1 %vm2868_vm1, %v2867_v36 }
 0x4c7   : > { %2522 = vmatprep.subr.mxu1 %v2867_v36  ;;  %v1532_v26 = vpop.permute.xlu1 %1531 }
 0x4c9   : > { %2515 = vmatmul.mubr.msk.f32.vlgmr.msra.gmra.mrb[6].mxu1 %vm599_vm2, %v849_v23 }
 0x4ca   : > { %2523 = vmatpush3.msra.mxu1 %v1016_v14  ;;  %2524 = vmatprep.mubr.msk.f32.mxu1 %vm2868_vm1, %v2867_v36 }
 0x4cb   : > { %2532 = vmatprep.subr.mxu1 %v2867_v36 }
 0x4ec   : > { %v1012_v24 = vpop.xlane.xlu0 %1011 }
 0x4ed   : > { %2772 = vrcp.f32 %v1012_v24 }
 0x4ee   : > { %2774 = vrcp.f32 %v1177_v41 }
 0x4f0   : > { %v1363_v25 = vpop.xlane.xlu0 %1362 }
 0x4f1   : > { %2776 = vrcp.f32 %v1363_v25 }
 0x4f4   : > { %v1693_v29 = vpop.xlane.xlu0 %1692 }
 0x4f7   : > { %v2773_v27 = vpop.eup %2772 }
 0x4f8   : > { %v1014_v28 = vmul.f32 %v2773_v27, %v2759_v2  ;;  %v1528_v30 = vpop.xlane.xlu1 %1527  ;;  %v2775_v31 = vpop.eup %2774 }
 0x4f9   : > { %2778 = vrcp.f32 %v1528_v30  ;;  %v1179_v32 = vmul.f32 %v2775_v31, %v3143_v52  ;;  %v1953_v52 = vld [vmem:[%s3392_s4 + $0x8] sm:$0xff] }
 0x4fa   : > { %2525 = vmatmul.mubr.msk.f32.vlgmr.msra.gmra.mrb[8].mxu1 %vm599_vm2, %v1014_v28  ;;  %2780 = vrcp.f32 %v1693_v29  ;;  %v2642_v53 = vpack.c.bf16 %v1953_v52, %v1952_v51  ;;  %v2192_v51 = vld [vmem:[%s3378_s12 + $0x30] sm:$0xff]  ;;  %v2193_v52 = vld [vmem:[%s3378_s12 + $0x38] sm:$0xff] }
 0x4fb   : > { %2533 = vmatpush3.msra.mxu1 %v1181_v15  ;;  %2534 = vmatprep.mubr.msk.f32.mxu1 %vm2868_vm1, %v2867_v36  ;;  %v2777_v33 = vpop.eup %2776 }
 0x4fc   : > { %2542 = vmatprep.subr.mxu1 %v2867_v36  ;;  %v1365_v34 = vmul.f32 %v2777_v33, %v2761_v3  ;;  %v1862_v44 = vpop.permute.xlu1 %1861  ;;  %v2092_v33 = vld [vmem:[%s3376_s10] sm:$0xff] }
 0x4fe   : > { %2535 = vmatmul.mubr.msk.f32.vlgmr.msra.gmra.mrb[10].mxu1 %vm599_vm2, %v1179_v32 }
 0x4ff   : > { %2543 = vmatpush3.msra.mxu1 %v1367_v16  ;;  %2544 = vmatprep.mubr.msk.f32.mxu1 %vm2868_vm1, %v2867_v36 }
 0x500   : > { %v1858_v35 = vpop.xlane.xlu0 %1857  ;;  %2552 = vmatprep.subr.mxu1 %v2867_v36 }
 0x501   : > { %2782 = vrcp.f32 %v1858_v35 }
 0x502   : > { %2545 = vmatmul.mubr.msk.f32.vlgmr.msra.gmra.mrb[12].mxu1 %vm599_vm2, %v1365_v34  ;;  %v2093_v34 = vld [vmem:[%s3376_s10 + $0x8] sm:$0xff] }
 0x503   : > { %v2779_v37 = vpop.eup %2778  ;;  %2553 = vmatpush3.msra.mxu1 %v1532_v26  ;;  %2554 = vmatprep.mubr.msk.f32.mxu1 %vm2868_vm1, %v2867_v36  ;;  %v2650_v35 = vpack.c.bf16 %v2093_v34, %v2092_v33 }
 0x504   : > { %v1530_v38 = vmul.f32 %v2779_v37, %v2765_v10  ;;  %v1697_v39 = vpop.permute.xlu0 %1696  ;;  %2562 = vmatprep.subr.mxu1 %v2867_v36  ;;  %v2781_v42 = vpop.eup %2780  ;;  %v2094_v37 = vld [vmem:[%s3376_s10 + $0x10] sm:$0xff] }
 0x505   : > { %v1695_v43 = vmul.f32 %v2781_v42, %v3152_v6  ;;  %v2186_v42 = vld [vmem:[%s3378_s12] sm:$0xff] }
 0x506   : > { %2555 = vmatmul.mubr.msk.f32.vlgmr.msra.gmra.mrb[14].mxu1 %vm599_vm2, %v1530_v38  ;;  %v2095_v38 = vld [vmem:[%s3376_s10 + $0x18] sm:$0xff] }
 0x507   : > { %2563 = vmatpush3.msra.mxu1 %v1697_v39  ;;  %2564 = vmatprep.mubr.msk.f32.mxu1 %vm2868_vm1, %v2867_v36  ;;  %v2654_v39 = vpack.c.bf16 %v2095_v38, %v2094_v37 }
 0x508   : > { %2572 = vmatprep.subr.mxu1 %v2867_v36 }
 0x50a   : > { %2565 = vmatmul.mubr.msk.f32.vlgmr.msra.gmra.mrb[16].mxu1 %vm599_vm2, %v1695_v43  ;;  %v2187_v43 = vld [vmem:[%s3378_s12 + $0x8] sm:$0xff] }
 0x50b   : > { %v2783_v45 = vpop.eup %2782  ;;  %2573 = vmatpush3.msra.mxu1 %v1862_v44  ;;  %2574 = vmatprep.mubr.msk.f32.mxu1 %vm2868_vm1, %v2867_v36  ;;  %v2188_v44 = vld [vmem:[%s3378_s12 + $0x10] sm:$0xff] }
 0x50c   : > { %v1860_v46 = vmul.f32 %v2783_v45, %v3157_v12  ;;  %2643 = vmatprep.subr.bf16.mxu1 %v2642_v53  ;;  %v2658_v45 = vpack.c.bf16 %v2187_v43, %v2186_v42 }
 0x50e   : > { %2575 = vmatmul.mubr.msk.f32.vlgmr.msra.gmra.mrb[18].mxu1 %vm599_vm2, %v1860_v46  ;;  %v2189_v46 = vld [vmem:[%s3378_s12 + $0x18] sm:$0xff]  ;;  %2659 = vmatprep.subr.bf16.mxu0 %v2658_v45 }
 0x50f   : > { %2645 = vmatpush3.bf16.msra.mxu1 %v2642_v53  ;;  %2661 = vmatpush3.bf16.msra.mxu0 %v2658_v45  ;;  %v2194_v53 = vld [vmem:[%s3378_s12 + $0x40] sm:$0xff] }
 0x510   : > { %2647 = vmatprep.subr.bf16.mxu1 %v2646_v58 }
 0x513   : > { %2649 = vmatpush3.bf16.msra.mxu1 %v2646_v58 }
 0x514   : > { %2651 = vmatprep.subr.bf16.mxu1 %v2650_v35 }
 0x598   : > { %v757_v47 = vpop.f32.mrb[4].mxu1 }
 0x599   : > { %v2506_v48 = vpop.f32.mrb[5].mxu1 }
 0x59a   : > { %v2190_v48 = vld [vmem:[%s3378_s12 + $0x20] sm:$0xff] }
 0x59c   : > { %v922_v49 = vpop.f32.mrb[6].mxu1 }
 0x59d   : > { %1257 = vrot.lane.b32.xlu0 %v922_v49, %s3381_s30  ;;  %v2516_v50 = vpop.f32.mrb[7].mxu1  ;;  %v2191_v49 = vld [vmem:[%s3378_s12 + $0x28] sm:$0xff]  ;;  %s439_s30 = sand.u32 1, %s2856_s19  }
 0x59e   : > { %v2666_v50 = vpack.c.bf16 %v2191_v49, %v2190_v48  ;;  %s2369_s17 = sshll.u32 %s439_s30, 4  ;;  %s3324_s21 = scalar_lea.sflag [#allocation5], %s439_s30 }
 0x59f   : > { %s441_s2 = scalar_lea.vmem [#allocation4], %s2369_s17 }
 0x5a0   : > { %s2303_s3 = sshll.u32 %s441_s2, 4  ;;  %s3314_s3 = int_to_ptr.vmem [resolvable:$true] %s2303_s3 }
 0x5a1   : > { %s2800_s17 = scalar_lea.vmem %s3314_s3, 256 }
 0x5a2   : > { %p2801_p2 = scmp.ne.s32.totalorder %s3314_s3, %s2800_s17 }
 0x5a4   : > { %p2802_p3 = pnand %p2801_p2, %p3002_p10 }
 0x5a6   : > { %p2803_p4 = pneg %p2802_p3 }
 0x5cd   : > { %v1087_v36 = vpop.f32.mrb[8].mxu1 }
 0x5ce   : > { %1261 = vrot.lane.b32.xlu1 %v1087_v36, %s2882_s29  ;;  %v2526_v54 = vpop.f32.mrb[9].mxu1  ;;  %v2670_v36 = vpack.c.bf16 %v2193_v52, %v2192_v51 }
 0x5cf   : > { %v2195_v54 = vld [vmem:[%s3378_s12 + $0x48] sm:$0xff] }
 0x5d0   : > { %v2674_v55 = vpack.c.bf16 %v2195_v54, %v2194_v53 }
 0x5d1   : > { %v1252_v57 = vpop.f32.mrb[10].mxu1 }
 0x5d2   : > { %1265 = vrot.lane.b32.xlu1 %v1252_v57, %s2883_s15  ;;  %v2536_v59 = vpop.f32.mrb[11].mxu1  ;;  %v2197_v57 = vld [vmem:[%s3378_s12 + $0x58] sm:$0xff] }
 0x5d3   : > { %v2678_v58 = vpack.c.bf16 %v2197_v57, %v2196_v56  ;;  %v2198_v59 = vld [vmem:[%s3378_s12 + $0x60] sm:$0xff] }
 0x5d5   : > { %v1438_v60 = vpop.f32.mrb[12].mxu1 }
 0x5d6   : > { %v2546_v61 = vpop.f32.mrb[13].mxu1 }
 0x5d9   : > { %v1603_v62 = vpop.f32.mrb[14].mxu1 }
 0x5da   : > { %1938 = vrot.lane.b32.xlu0 %v1603_v62, %s3393_s16  ;;  %v2556_v63 = vpop.f32.mrb[15].mxu1 }
 0x5dd   : > { %v1768_v2 = vpop.f32.mrb[16].mxu1 }
 0x5de   : > { %1942 = vrot.lane.b32.xlu0 %v1768_v2, %s2882_s29  ;;  %v2566_v40 = vpop.f32.mrb[17].mxu1  ;;  %s2804_s29 = sshll.u32 %s2884_s22, 4  ;;  %s2805_s29 = int_to_ptr.vmem [resolvable:$false] %s2804_s29 }
 0x5df   : > { %s2806_s4 = scalar_lea.vmem %s2805_s29, 512  ;;  %p2807_p5 = scmp.lt.s32.totalorder %s3314_s3, %s2805_s29 }
 0x5e0   : > { %p2808_p6 = scmp.lt.s32.totalorder %s2806_s4, %s2800_s17 }
 0x5e1   : > { %v1933_v3 = vpop.f32.mrb[18].mxu1 }
 0x5e2   : > { %1946 = vrot.lane.b32.xlu1 %v1933_v3, %s2883_s15  ;;  %v2576_v4 = vpop.f32.mrb[19].mxu1  ;;  %s3320_s15 = scalar_lea.hbm %s3380_s14, %s2417_s24  ;;  %p2809_p7 = por %p2808_p6, %p2807_p5 }
 0x5e4   : > { %p2810_p8 = pnand %p2809_p7, %p2803_p4 }
 0x60f   : > { %v1258_v5 = vpop.permute.xlu0 %1257 }
 0x610   : > { %v1268_v7 = vsel %vm599_vm2, %v757_v47, %v1258_v5  ;;  %v2662_v47 = vpack.c.bf16 %v2189_v46, %v2188_v44 }
 0x612   : > { %2663 = vmatprep.subr.bf16.mxu0 %v2662_v47 }
 0x613   : > { %2665 = vmatpush3.bf16.msra.mxu0 %v2662_v47 }
 0x614   : > { %2667 = vmatprep.subr.bf16.mxu0 %v2666_v50 }
 0x617   : > { %2669 = vmatpush3.bf16.msra.mxu0 %v2666_v50 }
 0x618   : > { %2671 = vmatprep.subr.bf16.mxu0 %v2670_v36 }
 0x61b   : > { %2673 = vmatpush3.bf16.msra.mxu0 %v2670_v36 }
 0x61c   : > { %2675 = vmatprep.subr.bf16.mxu0 %v2674_v55 }
 0x61f   : > { %2677 = vmatpush3.bf16.msra.mxu0 %v2674_v55 }
 0x620   : > { %2679 = vmatprep.subr.bf16.mxu0 %v2678_v58 }
 0x623   : > { %2681 = vmatpush3.bf16.msra.mxu0 %v2678_v58 }
 0x640   : > { %v1262_v6 = vpop.permute.xlu1 %1261 }
 0x641   : > { %v1270_v8 = vsel %vm1269_vm5, %v1268_v7, %v1262_v6  ;;  %v2405_v6 = vld [vmem:[%s3374_s8] ss:$0 sm:$0xff] }
 0x644   : > { %v1266_v9 = vpop.permute.xlu1 %1265 }
 0x645   : > { %v1272_v10 = vsel %vm1271_vm6, %v1270_v8, %v1266_v9  ;;  %v2406_v8 = vld [vmem:[%s3375_s9] ss:$0 sm:$0xff] }
 0x646   : > { %2585 = vmatprep.mubr.msk.f32.mxu1 %vm453_vm0, %v1272_v10 }
 0x64c   : > { %v1939_v11 = vpop.permute.xlu0 %1938 }
 0x64d   : > { %v1949_v13 = vsel %vm599_vm2, %v1438_v60, %v1939_v11  ;;  %v2199_v60 = vld [vmem:[%s3378_s12 + $0x68] sm:$0xff] }
 0x64e   : > { %v2682_v61 = vpack.c.bf16 %v2199_v60, %v2198_v59 }
 0x650   : > { %v1943_v12 = vpop.permute.xlu0 %1942  ;;  %2683 = vmatprep.subr.bf16.mxu0 %v2682_v61 }
 0x651   : > { %v1950_v14 = vsel %vm1269_vm5, %v1949_v13, %v1943_v12  ;;  %2685 = vmatpush3.bf16.msra.mxu0 %v2682_v61 }
 0x654   : > { %v1947_v15 = vpop.permute.xlu1 %1946 }
 0x655   : > { %v1951_v16 = vsel %vm1271_vm6, %v1950_v14, %v1947_v15  ;;  %v2200_v15 = vld [vmem:[%s3378_s12 + $0x70] sm:$0xff] }
 0x656   : > { %2586 = vmatmul.mubr.msk.f32.vlgmr.msra.gmra.mrb[20].mxu1 %vm453_vm0, %v1951_v16  ;;  %v2201_v16 = vld [vmem:[%s3378_s12 + $0x78] sm:$0xff] }
 0x657   : > { %2653 = vmatpush3.bf16.msra.mxu1 %v2650_v35 }
 0x658   : > { %2655 = vmatprep.subr.bf16.mxu1 %v2654_v39 }
 0x65b   : > { %2657 = vmatpush3.bf16.msra.mxu1 %v2654_v39 }
 0x729   : > { %v2587_v17 = vpop.f32.mrb[20].mxu1 }
 0x72a   : > { %v2038_v19 = vadd.f32 %v2587_v17, %v3022_v1  ;;  %v2028_v20 = vpop.f32.mrb[21].mxu1  ;;  %v2686_v17 = vpack.c.bf16 %v2201_v16, %v2200_v15 }
 0x72b   : > { %v2037_v21 = vadd.f32 %v2028_v20, %v3020_v0 }
 0x72c   : > { %v3220_v22 = vadd.f32 %v2404_v18, %v2038_v19  ;;  %2687 = vmatprep.subr.bf16.mxu0 %v2686_v17 }
 0x72d   : > { %v3222_v23 = vadd.f32 %v2404_v18, %v2037_v21  ;;  %2689 = vmatpush3.bf16.msra.mxu0 %v2686_v17  ;;  %v2407_v18 = vld [vmem:[%s3377_s11] ss:$0 sm:$0xff] }
 0x72e   : > { %v2053_v41 = vsel %vm453_vm0, %v3220_v22, 0.0 }
 0x72f   : > { %2054 = vadd.xlane.f32.xlu1 %v2053_v41  ;;  %v2050_v24 = vsel %vm453_vm0, %v3222_v23, 0.0 }
 0x730   : > { %2051 = vadd.xlane.f32.xlu0 %v2050_v24 }
 0x7bc   : > { %v2055_v25 = vpop.xlane.xlu1 %2054 }
 0x7bd   : > { %v2057_v26 = vmul.f32 0.03125, %v2055_v25  ;;  %v2052_v27 = vpop.xlane.xlu0 %2051 }
 0x7be   : > { %v2056_v28 = vmul.f32 0.03125, %v2052_v27 }
 0x7bf   : > { %v3229_v1 = vsub.f32 %v3220_v22, %v2057_v26  ;;  %v2410_v26 = vld [vmem:[%s3379_s13] ss:$0 sm:$0xff] }
 0x7c0   : > { %v2058_v0 = vsub.f32 %v3222_v23, %v2056_v28 }
 0x7c1   : > { %v2061_v31 = vmul.f32 %v3229_v1, %v3229_v1 }
 0x7c2   : > { %v2060_v29 = vmul.f32 %v2058_v0, %v2058_v0 }
 0x7c3   : > { %v2065_v32 = vsel %vm453_vm0, %v2061_v31, 0.0 }
 0x7c4   : > { %v2062_v30 = vsel %vm453_vm0, %v2060_v29, 0.0 }
 0x7c5   : > { %2063 = vadd.xlane.f32.xlu0 %v2062_v30 }
 0x7c9   : > { %2066 = vadd.xlane.f32.xlu0 %v2065_v32 }
 0x852   : > { %v2064_v62 = vpop.xlane.xlu0 %2063 }
 0x853   : > { %v2068_v63 = vmul.f32 0.03125, %v2064_v62 }
 0x855   : > { %v2070_v2 = vadd.f32 1e-05, %v2068_v63 }
 0x856   : > { %v2067_v40 = vpop.xlane.xlu0 %2066 }
 0x857   : > { %2784 = vrsqrt.f32 %v2070_v2  ;;  %v2069_v3 = vmul.f32 0.03125, %v2067_v40 }
 0x859   : > { %v2071_v4 = vadd.f32 1e-05, %v2069_v3 }
 0x85b   : > { %2786 = vrsqrt.f32 %v2071_v4 }
 0x861   : > { %v2785_v5 = vpop.eup %2784 }
 0x862   : > { %v2074_v7 = vmul.f32 %v2785_v5, %v2058_v0 }
 0x864   : > { %v2082_v9 = vmul.f32 %v2405_v6, %v2074_v7 }
 0x865   : > { %v2787_v10 = vpop.eup %2786 }
 0x866   : > { %v2075_v11 = vmul.f32 %v2787_v10, %v3229_v1  ;;  %v2090_v12 = vadd.f32 %v2406_v8, %v2082_v9 }
 0x868   : > { %v2083_v13 = vmul.f32 %v2405_v6, %v2075_v11  ;;  %2596 = vmatprep.mubr.msk.f32.mxu1 %vm453_vm0, %v2090_v12 }
 0x86a   : > { %v2091_v14 = vadd.f32 %v2406_v8, %v2083_v13 }
 0x86c   : > { %2597 = vmatmul.mubr.msk.f32.vlgmr.msra.gmra.mrb[22].mxu1 %vm453_vm0, %v2091_v14 }
 0x93f   : > { %v2598_v19 = vpop.f32.mrb[22].mxu1 }
 0x940   : > { %v2181_v20 = vadd.f32 %v2598_v19, %v2407_v18  ;;  %v2175_v21 = vpop.f32.mrb[23].mxu1 }
 0x941   : > { %v2176_v41 = vadd.f32 %v2407_v18, %v2175_v21 }
 0x942   : > { %v2185_v25 = vmax.f32 %v2181_v20, 0.0 }
 0x943   : > { %v2184_v24 = vmax.f32 %v2176_v41, 0.0 }
 0x945   : > { %2631 = vmatprep.mubr.f32.mxu0 %v2184_v24 }
 0x946   : > { %2632 = vmatmul.mubr.f32.vlgmr.msra.gmra.mrb[14].mxu0 %v2185_v25 }
 0xa19   : > { %v2633_v27 = vpop.f32.mrb[14].mxu0 }
 0xa1a   : > { %v2281_v28 = vadd.f32 %v2633_v27, %v2410_v26  ;;  %v2275_v1 = vpop.f32.mrb[15].mxu0 }
 0xa1b   : > { %v2276_v0 = vadd.f32 %v2410_v26, %v2275_v1 }
 0xa1c   : > { %v2285_v29 = vadd.f32 %v2281_v28, %v3220_v22 }
 0xa1d   : > { %v2284_v30 = vadd.f32 %v2276_v0, %v3222_v23 }
 0xa1e   : > { %2411 = vst.msk [vmem:[%s441_s2 + $0x8] sm:$0xff] %vm453_vm0, %v2285_v29 }
 0xa1f   : > { %2286 = vst.msk [vmem:[%s441_s2] sm:$0xff] %vm453_vm0, %v2284_v30 }
 0xa20   : > { %2813 = shalt.err (!%p2810_p8)
}
 0xa21   : > { %s2814_s30 = scalar_lea.hbm %s3320_s15, 256  ;;  %s2818_s25 = scalar_lea.hbm %s3380_s14, 512 }
 0xa22   : > { %p2815_p9 = scmp.ne.s32.totalorder %s3320_s15, %s2814_s30  ;;  %p2819_p0 = scmp.lt.u32.totalorder %s3320_s15, %s3380_s14 }
 0xa23   : > { %p2820_p1 = scmp.lt.u32.totalorder %s2818_s25, %s2814_s30  ;;  %p2822_p3 = scmp.lt.u32.totalorder %s2814_s30, %s3320_s15 }
 0xa24   : > { %p2816_p12 = pnand %p2815_p9, %p3002_p10 }
 0xa25   : > { %p2821_p2 = por %p2820_p1, %p2819_p0 }
 0xa26   : > { %p2817_p13 = pneg %p2816_p12 }
 0xa27   : > { %p2823_p4 = por %p2822_p3, %p2821_p2 }
 0xa29   : > { %p2824_p5 = pnand %p2823_p4, %p2817_p13 }
 0xa2b   : > { %2827 = shalt.err (!%p2824_p5)
}
 0xa2c   : > { %s2885_s4 = smov 128  }
 0xa2d   : > { %2690 = dma.vmem_to_hbm [thread:$0]  (%p3002_p10), %s3314_s3, 256, %s3320_s15, %s3324_s21, %s2885_s4, %s2885_s4, %s3393_s16  }
 0xa2e PF: > { %p2696_p6 = scmp.ge.s32.totalorder %s2864_s20, 2  ;;  %s2318_s17 = sand.u32 1, %s2852_s18  }
 0xa2f   : > { %s2319_s29 = scalar_lea.sflag [#allocation5], %s2318_s17 }
 0xa30   : > { %p2693_p7 = pnand %p2696_p6, %p3006_p11 }
 0xa32   : > { %2847 = dma.done.wait (!%p2693_p7), %s2319_s29, 256  }
 0xa33   : > { %2849 = vsyncadd (!%p2693_p7), %s2319_s29, 4294967040  ;;  %p30_p8 = scmp.ge.s32.totalorder %s2989_s23, 4   ;;  %s3394_s18 = smov %s2856_s19 }
 0xa34   : > { %s3395_s19 = smov %s2860_s0  ;;  %s3396_s0 = smov %s3000_s26 }
 0xa35   : > { %s3397_s20 = smov %s2989_s23  ;;  %32 = sbr.rel (!%p30_p8) target bundleno = 20 (0x14), region = 108 }
 0xa3c   :  { %2324 = vsyncpa [#allocation5], 1 }
 0xa3d   :  { %2326 = vsyncpa [#allocation5 + $0x1], 1 }

</bundles_post_ra>
